<compile_context>
chip_gen: v5e
topology: v5e:2x2
jax: 0.10.0
libtpu: 0.0.40
codegen_flags: <defaults>
</compile_context>

<pallas_src>
import math
import numpy as np
import jax
import jax.numpy as jnp
from jax import lax
from jax.scipy.special import logsumexp
from jax.experimental import pallas as pl
from jax.experimental.pallas import tpu as pltpu

Z_SIZE = 32
NUM_ACTIONS = 2
HIDDEN = 32
NUM_MIX = 5
D_IN = Z_SIZE + NUM_ACTIONS          # 34
NOUT = NUM_MIX * 3 * Z_SIZE          # 480
RECON_H = 64
HEAD_COLS = NOUT + RECON_H           # 544
SLAB_COLS = NOUT + Z_SIZE            # 512 = 4 x 128 lanes
SEQ_LEN = 8


# ----------------------------------------------------------------------------
# Pallas kernel: batched LSTM recurrence + fused MDN/recon head
# ----------------------------------------------------------------------------
def rnn_forward_kernel(x_ref,        # (T, BB, D_IN)  time-major batch block
                       w_ih_ref,     # (D_IN, 4H)     fused gate blocks i|f|g|o
                       w_hh_ref,     # (H, 4H)
                       b_ref,        # (1, 4H)        b_ih + b_hh
                       w_head_ref,   # (H, 544)       [mdn(480) | recon1(64)]
                       b_head_ref,   # (1, 544)
                       w_r2_ref,     # (64, Z)
                       b_r2_ref,     # (1, Z)
                       h_out_ref,    # (T, BB, H)
                       out_ref,      # (T, BB, 512) = [lw | mu | ls | zp]
                       head_sc):     # (T*BB, 544) VMEM scratch
    T, BB, D = x_ref.shape
    H = w_hh_ref.shape[0]
    Z = w_r2_ref.shape[1]
    NM = NUM_MIX

    # ---- input projection hoisted off the serial chain: (T*BB,D)@(D,4H) ----
    x_all = x_ref[...].reshape(T * BB, D)
    x_proj = jnp.dot(x_all, w_ih_ref[...],
                     preferred_element_type=jnp.float32) + b_ref[...]   # (T*BB,4H)

    w_hh = w_hh_ref[...]
    w_head = w_head_ref[...]
    b_head = b_head_ref[...]

    # ---- LSTM recurrence: one (BB,H)@(H,4H) matmul + 3 EUP ops per step ----
    h = jnp.zeros((BB, H), jnp.float32)
    c = jnp.zeros((BB, H), jnp.float32)
    for t in range(T):                    # T static (=8) -> fully unrolled
        gates = x_proj[t * BB:(t + 1) * BB, :] + jnp.dot(
            h, w_hh, preferred_element_type=jnp.float32)        # (BB, 4H)
        sig = jax.nn.sigmoid(gates)                  # i | f | . | o  (1 EUP op)
        g_g = jnp.tanh(gates[:, 2 * H:3 * H])        # g              (1 EUP op)
        c = sig[:, H:2 * H] * c + sig[:, 0:H] * g_g
        h = sig[:, 3 * H:4 * H] * jnp.tanh(c)        #                (1 EUP op)
        h_out_ref[t, :, :] = h
        # Head matmul depends only on h_t -> hidden under steps t+1..T.
        head_sc[t * BB:(t + 1) * BB, :] = (
            jnp.dot(h, w_head, preferred_element_type=jnp.float32) + b_head)

    # ---- epilogue: MDN logsumexp + recon layer 2, one 512-wide store ----
    head = head_sc[...]                                          # (T*BB, 544)
    lw = [head[:, m * Z:(m + 1) * Z] for m in range(NM)]         # NM x (rows, Z)
    m_max = lw[0]
    for p in lw[1:]:
        m_max = jnp.maximum(m_max, p)
    s = jnp.zeros_like(m_max)
    for p in lw:
        s = s + jnp.exp(p - m_max)
    lse = m_max + jnp.log(s)                                     # (rows, Z)
    lw_norm = jnp.concatenate([p - lse for p in lw], axis=1)     # (rows, NM*Z)

    r1 = jnp.maximum(head[:, 3 * NM * Z:], 0.0)                  # (rows, 64)
    zp = jnp.dot(r1, w_r2_ref[...],
                 preferred_element_type=jnp.float32) + b_r2_ref[...]   # (rows, Z)

    slab = jnp.concatenate([lw_norm, head[:, NM * Z:3 * NM * Z], zp], axis=1)
    out_ref[...] = slab.reshape(T, BB, SLAB_COLS)                # lane-dense


# ----------------------------------------------------------------------------
# One-time parameter re-layout (hoisted out of the per-call path)
# ----------------------------------------------------------------------------
def prepare_params(P):
    """Re-layout PyTorch-layout params into the kernel layout. Call once."""
    H, Z, NM = HIDDEN, Z_SIZE, NUM_MIX
    f32 = lambda a: jnp.asarray(a, jnp.float32)

    # Fused LSTM weights: torch (4H, D) row = gate*H + unit -> kernel column.
    w_ih = f32(P["w_ih"]).T                        # (D_IN, 4H), blocks i|f|g|o
    w_hh = f32(P["w_hh"]).T                        # (H, 4H)
    b = (f32(P["b_ih"]) + f32(P["b_hh"])).reshape(1, 4 * H)

    # MDN: torch row r = z*(3*NM) + part*NM + m
    #      -> kernel col c = part*(NM*Z) + m*Z + z
    idx = np.arange(NOUT).reshape(Z, 3, NM)        # idx[z, part, m] = torch row
    perm = idx.transpose(1, 2, 0).reshape(-1)      # perm[c] = torch row
    w_mdn = f32(P["w_mdn"])[perm].T                # (H, 480)
    b_mdn = f32(P["b_mdn"])[perm].reshape(1, NOUT)

    # recon MLP
    w_r1 = f32(P["w_r1"]).T                        # (H, 64)
    b_r1 = f32(P["b_r1"]).reshape(1, RECON_H)
    w_r2 = f32(P["w_r2"]).T                        # (64, Z)
    b_r2 = f32(P["b_r2"]).reshape(1, Z)

    # fused head = [mdn | recon layer 1]
    w_head = jnp.concatenate([w_mdn, w_r1], axis=1)    # (H, 544)
    b_head = jnp.concatenate([b_mdn, b_r1], axis=1)    # (1, 544)

    return dict(w_ih=w_ih, w_hh=w_hh, b=b,
                w_head=w_head, b_head=b_head, w_r2=w_r2, b_r2=b_r2)


# ----------------------------------------------------------------------------
# Wrappers
# ----------------------------------------------------------------------------
def _pick_batch_block(B):
    # One grid block per TensorCore (v7x megacore) when each half still fills
    # all 8 f32 sublanes; otherwise a single block.
    if B >= 16 and B % 2 == 0 and (B // 2) % 8 == 0:
        return B // 2
    return B


def rnn_forward_raw(z_a, KP):
    """Kernel-native (lane-dense, time-major) outputs.

    z_a: (B, T, D_IN) f32.
    Returns:
      h_seq: (T, B, H)
      slab:  (T, B, 512) = [lw_norm(160) | mean(160) | logstd(160) | z_pred(32)],
             MDN column = part*NM*Z + m*Z + z.
    """
    B, T, _ = z_a.shape
    BB = _pick_batch_block(B)
    num_blocks = B // BB
    x = jnp.transpose(z_a.astype(jnp.float32), (1, 0, 2))       # (T, B, D_IN)

    out_shape = (
        jax.ShapeDtypeStruct((T, B, HIDDEN), jnp.float32),
        jax.ShapeDtypeStruct((T, B, SLAB_COLS), jnp.float32),
    )
    in_specs = [
        pl.BlockSpec((T, BB, D_IN), lambda j: (0, j, 0)),
        pl.BlockSpec((D_IN, 4 * HIDDEN), lambda j: (0, 0)),
        pl.BlockSpec((HIDDEN, 4 * HIDDEN), lambda j: (0, 0)),
        pl.BlockSpec((1, 4 * HIDDEN), lambda j: (0, 0)),
        pl.BlockSpec((HIDDEN, HEAD_COLS), lambda j: (0, 0)),
        pl.BlockSpec((1, HEAD_COLS), lambda j: (0, 0)),
        pl.BlockSpec((RECON_H, Z_SIZE), lambda j: (0, 0)),
        pl.BlockSpec((1, Z_SIZE), lambda j: (0, 0)),
    ]
    out_specs = (
        pl.BlockSpec((T, BB, HIDDEN), lambda j: (0, j, 0)),
        pl.BlockSpec((T, BB, SLAB_COLS), lambda j: (0, j, 0)),
    )
    return pl.pallas_call(
        rnn_forward_kernel,
        out_shape=out_shape,
        grid=(num_blocks,),
        in_specs=in_specs,
        out_specs=out_specs,
        scratch_shapes=[pltpu.VMEM((T * BB, HEAD_COLS), jnp.float32)],
        compiler_params=pltpu.CompilerParams(
            dimension_semantics=("parallel",)),
    )(x, KP["w_ih"], KP["w_hh"], KP["b"],
      KP["w_head"], KP["b_head"], KP["w_r2"], KP["b_r2"])


def rnn_forward(z_a, KP):
    """PyTorch-layout outputs (parity with the reference module).
    Prefer rnn_forward_raw() downstream to avoid the per-call transposes."""
    B, T = z_a.shape[0], z_a.shape[1]
    Z, NM = Z_SIZE, NUM_MIX
    h_tbh, slab = rnn_forward_raw(z_a, KP)
    h = jnp.transpose(h_tbh, (1, 0, 2))                          # (B, T, H)
    mdn = jnp.transpose(slab[:, :, :3 * NM * Z], (1, 0, 2))      # (B, T, 480)
    mdn = mdn.reshape(B * T, 3, NM, Z)
    to_torch = lambda a: jnp.transpose(a, (0, 2, 1))[None]  # (BT,NM,Z)->(1,BT,Z,NM)
    zp = jnp.transpose(slab[:, :, 3 * NM * Z:], (1, 0, 2))       # (B, T, Z)
    return (h, to_torch(mdn[:, 0]), to_torch(mdn[:, 1]),
            to_torch(mdn[:, 2]), zp)


# ----------------------------------------------------------------------------
# Pure-JAX reference (numerical sanity check, PyTorch semantics)
# ----------------------------------------------------------------------------
def ref_forward(z_a, P):
    B, T, _ = z_a.shape
    H, Z, NM = HIDDEN, Z_SIZE, NUM_MIX
    hi = jax.lax.Precision.HIGHEST

    def step(carry, x_t):
        h, c = carry
        gates = (jnp.dot(x_t, P["w_ih"].T, precision=hi) + P["b_ih"]
                 + jnp.dot(h, P["w_hh"].T, precision=hi) + P["b_hh"])
        i = jax.nn.sigmoid(gates[:, :H]); f = jax.nn.sigmoid(gates[:, H:2 * H])
        g = jnp.tanh(gates[:, 2 * H:3 * H]); o = jax.nn.sigmoid(gates[:, 3 * H:])
        c2 = f * c + i * g
        h2 = o * jnp.tanh(c2)
        return (h2, c2), h2

    xs = jnp.transpose(z_a, (1, 0, 2))                           # (T, B, D)
    (_, _), hs = lax.scan(step, (jnp.zeros((B, H)), jnp.zeros((B, H))), xs)
    out = jnp.transpose(hs, (1, 0, 2))                           # (B, T, H)
    vecs = jnp.dot(out, P["w_mdn"].T, precision=hi) + P["b_mdn"]
    vecs = vecs.reshape(1, -1, Z, NM * 3)                        # (1, B*T, Z, 3NM)
    lw, mu, ls = vecs[..., :NM], vecs[..., NM:2 * NM], vecs[..., 2 * NM:]
    lw = lw - logsumexp(lw, axis=3, keepdims=True)
    r = jnp.maximum(jnp.dot(out, P["w_r1"].T, precision=hi) + P["b_r1"], 0.0)
    zp = jnp.dot(r, P["w_r2"].T, precision=hi) + P["b_r2"]
    return out, lw, mu, ls, zp


# ----------------------------------------------------------------------------
def make_params(key):
    ks = jax.random.split(key, 10)
    u = lambda k, shape, s: jax.random.uniform(k, shape, jnp.float32, -s, s)
    sH = 1.0 / math.sqrt(HIDDEN)
    s64 = 1.0 / math.sqrt(RECON_H)
    return dict(
        w_ih=u(ks[0], (4 * HIDDEN, D_IN), sH),
        w_hh=u(ks[1], (4 * HIDDEN, HIDDEN), sH),
        b_ih=u(ks[2], (4 * HIDDEN,), sH),
        b_hh=u(ks[3], (4 * HIDDEN,), sH),
        w_mdn=u(ks[4], (NOUT, HIDDEN), sH),
        b_mdn=u(ks[5], (NOUT,), sH),
        w_r1=u(ks[6], (RECON_H, HIDDEN), sH),
        b_r1=u(ks[7], (RECON_H,), sH),
        w_r2=u(ks[8], (Z_SIZE, RECON_H), s64),
        b_r2=u(ks[9], (Z_SIZE,), s64),
    )


if __name__ == "__main__":
    key = jax.random.PRNGKey(0)
    k_p, k_x = jax.random.split(key)
    P = make_params(k_p)
    B = 8                                   # fills all 8 f32 sublanes per step
    z_a = jax.random.normal(k_x, (B, SEQ_LEN, D_IN), jnp.float32)

    KP = jax.block_until_ready(prepare_params(P))   # one-time re-layout
    fwd = jax.jit(rnn_forward)
    outs = jax.block_until_ready(fwd(z_a, KP))

    refs = ref_forward(z_a, P)
    names = ["h_out", "logweight", "mean", "logstd", "z_prediction"]
    for n, a, b in zip(names, outs, refs):
        assert a.shape == b.shape, (n, a.shape, b.shape)
        np.testing.assert_allclose(np.asarray(a), np.asarray(b),
                                   atol=5e-3, rtol=5e-3, err_msg=n)

    print("KERNEL_OK")
</pallas_src>

<mosaic_0001>
module attributes {stable_mosaic.version = 11 : i64} {
  func.func @rnn_forward_kernel(%arg0: i32, %arg1: memref<8x8x34xf32, #tpu.memory_space<vmem>>, %arg2: memref<34x128xf32, #tpu.memory_space<vmem>>, %arg3: memref<32x128xf32, #tpu.memory_space<vmem>>, %arg4: memref<1x128xf32, #tpu.memory_space<vmem>>, %arg5: memref<32x544xf32, #tpu.memory_space<vmem>>, %arg6: memref<1x544xf32, #tpu.memory_space<vmem>>, %arg7: memref<64x32xf32, #tpu.memory_space<vmem>>, %arg8: memref<1x32xf32, #tpu.memory_space<vmem>>, %arg9: memref<8x8x32xf32, #tpu.memory_space<vmem>>, %arg10: memref<8x8x512xf32, #tpu.memory_space<vmem>>, %arg11: memref<64x544xf32, #tpu.memory_space<vmem>>) attributes {dimension_semantics = [#tpu.dimension_semantics<parallel>], iteration_bounds = array<i64: 1>, scalar_prefetch = 0 : i64, scratch_operands = 1 : i64, tpu.core_type = #tpu.core_type<tc>, window_params = [{transform_indices = @transform_0, window_bounds = array<i64: 8, 8, 34>}, {pipeline_mode = #tpu.pipeline_mode<synchronous>, transform_indices = @transform_1, window_bounds = array<i64: 34, 128>}, {pipeline_mode = #tpu.pipeline_mode<synchronous>, transform_indices = @transform_2, window_bounds = array<i64: 32, 128>}, {pipeline_mode = #tpu.pipeline_mode<synchronous>, transform_indices = @transform_3, window_bounds = array<i64: 1, 128>}, {pipeline_mode = #tpu.pipeline_mode<synchronous>, transform_indices = @transform_4, window_bounds = array<i64: 32, 544>}, {pipeline_mode = #tpu.pipeline_mode<synchronous>, transform_indices = @transform_5, window_bounds = array<i64: 1, 544>}, {pipeline_mode = #tpu.pipeline_mode<synchronous>, transform_indices = @transform_6, window_bounds = array<i64: 64, 32>}, {pipeline_mode = #tpu.pipeline_mode<synchronous>, transform_indices = @transform_7, window_bounds = array<i64: 1, 32>}, {transform_indices = @transform_8, window_bounds = array<i64: 8, 8, 32>}, {transform_indices = @transform_9, window_bounds = array<i64: 8, 8, 512>}]} {
    %c0 = arith.constant 0 : index
    %c0_0 = arith.constant 0 : index
    %c0_1 = arith.constant 0 : index
    %0 = vector.load %arg1[%c0, %c0_0, %c0_1] : memref<8x8x34xf32, #tpu.memory_space<vmem>>, vector<8x8x34xf32>
    %1 = vector.shape_cast %0 : vector<8x8x34xf32> to vector<64x34xf32>
    %c0_2 = arith.constant 0 : index
    %c0_3 = arith.constant 0 : index
    %2 = vector.load %arg2[%c0_2, %c0_3] : memref<34x128xf32, #tpu.memory_space<vmem>>, vector<34x128xf32>
    %cst = arith.constant dense<0.000000e+00> : vector<64x128xf32>
    %3 = tpu.matmul %1, %2, %cst {dimension_numbers = #tpu.dot_dimension_numbers<[1], [0], [0], [1], [0, 0, 1, 1], [], []>} : vector<64x34xf32>, vector<34x128xf32>, vector<64x128xf32> -> vector<64x128xf32>
    %c0_4 = arith.constant 0 : index
    %c0_5 = arith.constant 0 : index
    %4 = vector.load %arg4[%c0_4, %c0_5] : memref<1x128xf32, #tpu.memory_space<vmem>>, vector<1x128xf32>
    %5 = vector.broadcast %4 : vector<1x128xf32> to vector<64x128xf32>
    %6 = arith.addf %3, %5 : vector<64x128xf32>
    %c0_6 = arith.constant 0 : index
    %c0_7 = arith.constant 0 : index
    %7 = vector.load %arg3[%c0_6, %c0_7] : memref<32x128xf32, #tpu.memory_space<vmem>>, vector<32x128xf32>
    %c0_8 = arith.constant 0 : index
    %c0_9 = arith.constant 0 : index
    %8 = vector.load %arg5[%c0_8, %c0_9] : memref<32x544xf32, #tpu.memory_space<vmem>>, vector<32x544xf32>
    %c0_10 = arith.constant 0 : index
    %c0_11 = arith.constant 0 : index
    %9 = vector.load %arg6[%c0_10, %c0_11] : memref<1x544xf32, #tpu.memory_space<vmem>>, vector<1x544xf32>
    %cst_12 = arith.constant 0.000000e+00 : f32
    %10 = vector.broadcast %cst_12 : f32 to vector<8x32xf32>
    %cst_13 = arith.constant 0.000000e+00 : f32
    %11 = vector.broadcast %cst_13 : f32 to vector<8x32xf32>
    %12 = vector.extract_strided_slice %6 {offsets = [0, 0], sizes = [8, 128], strides = [1, 1]} : vector<64x128xf32> to vector<8x128xf32>
    %cst_14 = arith.constant dense<0.000000e+00> : vector<8x128xf32>
    %13 = tpu.matmul %10, %7, %cst_14 {dimension_numbers = #tpu.dot_dimension_numbers<[1], [0], [0], [1], [0, 0, 1, 1], [], []>} : vector<8x32xf32>, vector<32x128xf32>, vector<8x128xf32> -> vector<8x128xf32>
    %14 = arith.addf %12, %13 : vector<8x128xf32>
    %15 = arith.negf %14 : vector<8x128xf32>
    %16 = math.exp %15 : vector<8x128xf32>
    %cst_15 = arith.constant 1.000000e+00 : f32
    %17 = vector.broadcast %cst_15 : f32 to vector<8x128xf32>
    %18 = arith.addf %17, %16 : vector<8x128xf32>
    %19 = arith.divf %17, %18 : vector<8x128xf32>
    %20 = vector.extract_strided_slice %14 {offsets = [0, 64], sizes = [8, 32], strides = [1, 1]} : vector<8x128xf32> to vector<8x32xf32>
    %21 = math.tanh %20 : vector<8x32xf32>
    %22 = vector.extract_strided_slice %19 {offsets = [0, 32], sizes = [8, 32], strides = [1, 1]} : vector<8x128xf32> to vector<8x32xf32>
    %23 = arith.mulf %22, %11 : vector<8x32xf32>
    %24 = vector.extract_strided_slice %19 {offsets = [0, 0], sizes = [8, 32], strides = [1, 1]} : vector<8x128xf32> to vector<8x32xf32>
    %25 = arith.mulf %24, %21 : vector<8x32xf32>
    %26 = arith.addf %23, %25 : vector<8x32xf32>
    %27 = vector.extract_strided_slice %19 {offsets = [0, 96], sizes = [8, 32], strides = [1, 1]} : vector<8x128xf32> to vector<8x32xf32>
    %28 = math.tanh %26 : vector<8x32xf32>
    %29 = arith.mulf %27, %28 : vector<8x32xf32>
    %c0_16 = arith.constant 0 : index
    %c0_17 = arith.constant 0 : index
    %c0_18 = arith.constant 0 : index
    %30 = vector.load %arg9[%c0_16, %c0_17, %c0_18] : memref<8x8x32xf32, #tpu.memory_space<vmem>>, vector<1x8x32xf32>
    %31 = vector.shape_cast %30 : vector<1x8x32xf32> to vector<8x32xf32>
    %32 = vector.shape_cast %29 : vector<8x32xf32> to vector<1x8x32xf32>
    tpu.vector_store %arg9[%c0_16, %c0_17, %c0_18], %32 {strides = array<i32>} : memref<8x8x32xf32, #tpu.memory_space<vmem>>, vector<1x8x32xf32>,
    %cst_19 = arith.constant dense<0.000000e+00> : vector<8x544xf32>
    %33 = tpu.matmul %29, %8, %cst_19 {dimension_numbers = #tpu.dot_dimension_numbers<[1], [0], [0], [1], [0, 0, 1, 1], [], []>} : vector<8x32xf32>, vector<32x544xf32>, vector<8x544xf32> -> vector<8x544xf32>
    %34 = vector.broadcast %9 : vector<1x544xf32> to vector<8x544xf32>
    %35 = arith.addf %33, %34 : vector<8x544xf32>
    %c0_20 = arith.constant 0 : index
    %c0_21 = arith.constant 0 : index
    %36 = vector.load %arg11[%c0_20, %c0_21] : memref<64x544xf32, #tpu.memory_space<vmem>>, vector<8x544xf32>
    tpu.vector_store %arg11[%c0_20, %c0_21], %35 {strides = array<i32>} : memref<64x544xf32, #tpu.memory_space<vmem>>, vector<8x544xf32>,
    %37 = vector.extract_strided_slice %6 {offsets = [8, 0], sizes = [8, 128], strides = [1, 1]} : vector<64x128xf32> to vector<8x128xf32>
    %cst_22 = arith.constant dense<0.000000e+00> : vector<8x128xf32>
    %38 = tpu.matmul %29, %7, %cst_22 {dimension_numbers = #tpu.dot_dimension_numbers<[1], [0], [0], [1], [0, 0, 1, 1], [], []>} : vector<8x32xf32>, vector<32x128xf32>, vector<8x128xf32> -> vector<8x128xf32>
    %39 = arith.addf %37, %38 : vector<8x128xf32>
    %40 = arith.negf %39 : vector<8x128xf32>
    %41 = math.exp %40 : vector<8x128xf32>
    %cst_23 = arith.constant 1.000000e+00 : f32
    %42 = vector.broadcast %cst_23 : f32 to vector<8x128xf32>
    %43 = arith.addf %42, %41 : vector<8x128xf32>
    %44 = arith.divf %42, %43 : vector<8x128xf32>
    %45 = vector.extract_strided_slice %39 {offsets = [0, 64], sizes = [8, 32], strides = [1, 1]} : vector<8x128xf32> to vector<8x32xf32>
    %46 = math.tanh %45 : vector<8x32xf32>
    %47 = vector.extract_strided_slice %44 {offsets = [0, 32], sizes = [8, 32], strides = [1, 1]} : vector<8x128xf32> to vector<8x32xf32>
    %48 = arith.mulf %47, %26 : vector<8x32xf32>
    %49 = vector.extract_strided_slice %44 {offsets = [0, 0], sizes = [8, 32], strides = [1, 1]} : vector<8x128xf32> to vector<8x32xf32>
    %50 = arith.mulf %49, %46 : vector<8x32xf32>
    %51 = arith.addf %48, %50 : vector<8x32xf32>
    %52 = vector.extract_strided_slice %44 {offsets = [0, 96], sizes = [8, 32], strides = [1, 1]} : vector<8x128xf32> to vector<8x32xf32>
    %53 = math.tanh %51 : vector<8x32xf32>
    %54 = arith.mulf %52, %53 : vector<8x32xf32>
    %c1 = arith.constant 1 : index
    %c0_24 = arith.constant 0 : index
    %c0_25 = arith.constant 0 : index
    %55 = vector.load %arg9[%c1, %c0_24, %c0_25] : memref<8x8x32xf32, #tpu.memory_space<vmem>>, vector<1x8x32xf32>
    %56 = vector.shape_cast %55 : vector<1x8x32xf32> to vector<8x32xf32>
    %57 = vector.shape_cast %54 : vector<8x32xf32> to vector<1x8x32xf32>
    tpu.vector_store %arg9[%c1, %c0_24, %c0_25], %57 {strides = array<i32>} : memref<8x8x32xf32, #tpu.memory_space<vmem>>, vector<1x8x32xf32>,
    %cst_26 = arith.constant dense<0.000000e+00> : vector<8x544xf32>
    %58 = tpu.matmul %54, %8, %cst_26 {dimension_numbers = #tpu.dot_dimension_numbers<[1], [0], [0], [1], [0, 0, 1, 1], [], []>} : vector<8x32xf32>, vector<32x544xf32>, vector<8x544xf32> -> vector<8x544xf32>
    %59 = vector.broadcast %9 : vector<1x544xf32> to vector<8x544xf32>
    %60 = arith.addf %58, %59 : vector<8x544xf32>
    %c8 = arith.constant 8 : index
    %c0_27 = arith.constant 0 : index
    %61 = vector.load %arg11[%c8, %c0_27] : memref<64x544xf32, #tpu.memory_space<vmem>>, vector<8x544xf32>
    tpu.vector_store %arg11[%c8, %c0_27], %60 {strides = array<i32>} : memref<64x544xf32, #tpu.memory_space<vmem>>, vector<8x544xf32>,
    %62 = vector.extract_strided_slice %6 {offsets = [16, 0], sizes = [8, 128], strides = [1, 1]} : vector<64x128xf32> to vector<8x128xf32>
    %cst_28 = arith.constant dense<0.000000e+00> : vector<8x128xf32>
    %63 = tpu.matmul %54, %7, %cst_28 {dimension_numbers = #tpu.dot_dimension_numbers<[1], [0], [0], [1], [0, 0, 1, 1], [], []>} : vector<8x32xf32>, vector<32x128xf32>, vector<8x128xf32> -> vector<8x128xf32>
    %64 = arith.addf %62, %63 : vector<8x128xf32>
    %65 = arith.negf %64 : vector<8x128xf32>
    %66 = math.exp %65 : vector<8x128xf32>
    %cst_29 = arith.constant 1.000000e+00 : f32
    %67 = vector.broadcast %cst_29 : f32 to vector<8x128xf32>
    %68 = arith.addf %67, %66 : vector<8x128xf32>
    %69 = arith.divf %67, %68 : vector<8x128xf32>
    %70 = vector.extract_strided_slice %64 {offsets = [0, 64], sizes = [8, 32], strides = [1, 1]} : vector<8x128xf32> to vector<8x32xf32>
    %71 = math.tanh %70 : vector<8x32xf32>
    %72 = vector.extract_strided_slice %69 {offsets = [0, 32], sizes = [8, 32], strides = [1, 1]} : vector<8x128xf32> to vector<8x32xf32>
    %73 = arith.mulf %72, %51 : vector<8x32xf32>
    %74 = vector.extract_strided_slice %69 {offsets = [0, 0], sizes = [8, 32], strides = [1, 1]} : vector<8x128xf32> to vector<8x32xf32>
    %75 = arith.mulf %74, %71 : vector<8x32xf32>
    %76 = arith.addf %73, %75 : vector<8x32xf32>
    %77 = vector.extract_strided_slice %69 {offsets = [0, 96], sizes = [8, 32], strides = [1, 1]} : vector<8x128xf32> to vector<8x32xf32>
    %78 = math.tanh %76 : vector<8x32xf32>
    %79 = arith.mulf %77, %78 : vector<8x32xf32>
    %c2 = arith.constant 2 : index
    %c0_30 = arith.constant 0 : index
    %c0_31 = arith.constant 0 : index
    %80 = vector.load %arg9[%c2, %c0_30, %c0_31] : memref<8x8x32xf32, #tpu.memory_space<vmem>>, vector<1x8x32xf32>
    %81 = vector.shape_cast %80 : vector<1x8x32xf32> to vector<8x32xf32>
    %82 = vector.shape_cast %79 : vector<8x32xf32> to vector<1x8x32xf32>
    tpu.vector_store %arg9[%c2, %c0_30, %c0_31], %82 {strides = array<i32>} : memref<8x8x32xf32, #tpu.memory_space<vmem>>, vector<1x8x32xf32>,
    %cst_32 = arith.constant dense<0.000000e+00> : vector<8x544xf32>
    %83 = tpu.matmul %79, %8, %cst_32 {dimension_numbers = #tpu.dot_dimension_numbers<[1], [0], [0], [1], [0, 0, 1, 1], [], []>} : vector<8x32xf32>, vector<32x544xf32>, vector<8x544xf32> -> vector<8x544xf32>
    %84 = vector.broadcast %9 : vector<1x544xf32> to vector<8x544xf32>
    %85 = arith.addf %83, %84 : vector<8x544xf32>
    %c16 = arith.constant 16 : index
    %c0_33 = arith.constant 0 : index
    %86 = vector.load %arg11[%c16, %c0_33] : memref<64x544xf32, #tpu.memory_space<vmem>>, vector<8x544xf32>
    tpu.vector_store %arg11[%c16, %c0_33], %85 {strides = array<i32>} : memref<64x544xf32, #tpu.memory_space<vmem>>, vector<8x544xf32>,
    %87 = vector.extract_strided_slice %6 {offsets = [24, 0], sizes = [8, 128], strides = [1, 1]} : vector<64x128xf32> to vector<8x128xf32>
    %cst_34 = arith.constant dense<0.000000e+00> : vector<8x128xf32>
    %88 = tpu.matmul %79, %7, %cst_34 {dimension_numbers = #tpu.dot_dimension_numbers<[1], [0], [0], [1], [0, 0, 1, 1], [], []>} : vector<8x32xf32>, vector<32x128xf32>, vector<8x128xf32> -> vector<8x128xf32>
    %89 = arith.addf %87, %88 : vector<8x128xf32>
    %90 = arith.negf %89 : vector<8x128xf32>
    %91 = math.exp %90 : vector<8x128xf32>
    %cst_35 = arith.constant 1.000000e+00 : f32
    %92 = vector.broadcast %cst_35 : f32 to vector<8x128xf32>
    %93 = arith.addf %92, %91 : vector<8x128xf32>
    %94 = arith.divf %92, %93 : vector<8x128xf32>
    %95 = vector.extract_strided_slice %89 {offsets = [0, 64], sizes = [8, 32], strides = [1, 1]} : vector<8x128xf32> to vector<8x32xf32>
    %96 = math.tanh %95 : vector<8x32xf32>
    %97 = vector.extract_strided_slice %94 {offsets = [0, 32], sizes = [8, 32], strides = [1, 1]} : vector<8x128xf32> to vector<8x32xf32>
    %98 = arith.mulf %97, %76 : vector<8x32xf32>
    %99 = vector.extract_strided_slice %94 {offsets = [0, 0], sizes = [8, 32], strides = [1, 1]} : vector<8x128xf32> to vector<8x32xf32>
    %100 = arith.mulf %99, %96 : vector<8x32xf32>
    %101 = arith.addf %98, %100 : vector<8x32xf32>
    %102 = vector.extract_strided_slice %94 {offsets = [0, 96], sizes = [8, 32], strides = [1, 1]} : vector<8x128xf32> to vector<8x32xf32>
    %103 = math.tanh %101 : vector<8x32xf32>
    %104 = arith.mulf %102, %103 : vector<8x32xf32>
    %c3 = arith.constant 3 : index
    %c0_36 = arith.constant 0 : index
    %c0_37 = arith.constant 0 : index
    %105 = vector.load %arg9[%c3, %c0_36, %c0_37] : memref<8x8x32xf32, #tpu.memory_space<vmem>>, vector<1x8x32xf32>
    %106 = vector.shape_cast %105 : vector<1x8x32xf32> to vector<8x32xf32>
    %107 = vector.shape_cast %104 : vector<8x32xf32> to vector<1x8x32xf32>
    tpu.vector_store %arg9[%c3, %c0_36, %c0_37], %107 {strides = array<i32>} : memref<8x8x32xf32, #tpu.memory_space<vmem>>, vector<1x8x32xf32>,
    %cst_38 = arith.constant dense<0.000000e+00> : vector<8x544xf32>
    %108 = tpu.matmul %104, %8, %cst_38 {dimension_numbers = #tpu.dot_dimension_numbers<[1], [0], [0], [1], [0, 0, 1, 1], [], []>} : vector<8x32xf32>, vector<32x544xf32>, vector<8x544xf32> -> vector<8x544xf32>
    %109 = vector.broadcast %9 : vector<1x544xf32> to vector<8x544xf32>
    %110 = arith.addf %108, %109 : vector<8x544xf32>
    %c24 = arith.constant 24 : index
    %c0_39 = arith.constant 0 : index
    %111 = vector.load %arg11[%c24, %c0_39] : memref<64x544xf32, #tpu.memory_space<vmem>>, vector<8x544xf32>
    tpu.vector_store %arg11[%c24, %c0_39], %110 {strides = array<i32>} : memref<64x544xf32, #tpu.memory_space<vmem>>, vector<8x544xf32>,
    %112 = vector.extract_strided_slice %6 {offsets = [32, 0], sizes = [8, 128], strides = [1, 1]} : vector<64x128xf32> to vector<8x128xf32>
    %cst_40 = arith.constant dense<0.000000e+00> : vector<8x128xf32>
    %113 = tpu.matmul %104, %7, %cst_40 {dimension_numbers = #tpu.dot_dimension_numbers<[1], [0], [0], [1], [0, 0, 1, 1], [], []>} : vector<8x32xf32>, vector<32x128xf32>, vector<8x128xf32> -> vector<8x128xf32>
    %114 = arith.addf %112, %113 : vector<8x128xf32>
    %115 = arith.negf %114 : vector<8x128xf32>
    %116 = math.exp %115 : vector<8x128xf32>
    %cst_41 = arith.constant 1.000000e+00 : f32
    %117 = vector.broadcast %cst_41 : f32 to vector<8x128xf32>
    %118 = arith.addf %117, %116 : vector<8x128xf32>
    %119 = arith.divf %117, %118 : vector<8x128xf32>
    %120 = vector.extract_strided_slice %114 {offsets = [0, 64], sizes = [8, 32], strides = [1, 1]} : vector<8x128xf32> to vector<8x32xf32>
    %121 = math.tanh %120 : vector<8x32xf32>
    %122 = vector.extract_strided_slice %119 {offsets = [0, 32], sizes = [8, 32], strides = [1, 1]} : vector<8x128xf32> to vector<8x32xf32>
    %123 = arith.mulf %122, %101 : vector<8x32xf32>
    %124 = vector.extract_strided_slice %119 {offsets = [0, 0], sizes = [8, 32], strides = [1, 1]} : vector<8x128xf32> to vector<8x32xf32>
    %125 = arith.mulf %124, %121 : vector<8x32xf32>
    %126 = arith.addf %123, %125 : vector<8x32xf32>
    %127 = vector.extract_strided_slice %119 {offsets = [0, 96], sizes = [8, 32], strides = [1, 1]} : vector<8x128xf32> to vector<8x32xf32>
    %128 = math.tanh %126 : vector<8x32xf32>
    %129 = arith.mulf %127, %128 : vector<8x32xf32>
    %c4 = arith.constant 4 : index
    %c0_42 = arith.constant 0 : index
    %c0_43 = arith.constant 0 : index
    %130 = vector.load %arg9[%c4, %c0_42, %c0_43] : memref<8x8x32xf32, #tpu.memory_space<vmem>>, vector<1x8x32xf32>
    %131 = vector.shape_cast %130 : vector<1x8x32xf32> to vector<8x32xf32>
    %132 = vector.shape_cast %129 : vector<8x32xf32> to vector<1x8x32xf32>
    tpu.vector_store %arg9[%c4, %c0_42, %c0_43], %132 {strides = array<i32>} : memref<8x8x32xf32, #tpu.memory_space<vmem>>, vector<1x8x32xf32>,
    %cst_44 = arith.constant dense<0.000000e+00> : vector<8x544xf32>
    %133 = tpu.matmul %129, %8, %cst_44 {dimension_numbers = #tpu.dot_dimension_numbers<[1], [0], [0], [1], [0, 0, 1, 1], [], []>} : vector<8x32xf32>, vector<32x544xf32>, vector<8x544xf32> -> vector<8x544xf32>
    %134 = vector.broadcast %9 : vector<1x544xf32> to vector<8x544xf32>
    %135 = arith.addf %133, %134 : vector<8x544xf32>
    %c32 = arith.constant 32 : index
    %c0_45 = arith.constant 0 : index
    %136 = vector.load %arg11[%c32, %c0_45] : memref<64x544xf32, #tpu.memory_space<vmem>>, vector<8x544xf32>
    tpu.vector_store %arg11[%c32, %c0_45], %135 {strides = array<i32>} : memref<64x544xf32, #tpu.memory_space<vmem>>, vector<8x544xf32>,
    %137 = vector.extract_strided_slice %6 {offsets = [40, 0], sizes = [8, 128], strides = [1, 1]} : vector<64x128xf32> to vector<8x128xf32>
    %cst_46 = arith.constant dense<0.000000e+00> : vector<8x128xf32>
    %138 = tpu.matmul %129, %7, %cst_46 {dimension_numbers = #tpu.dot_dimension_numbers<[1], [0], [0], [1], [0, 0, 1, 1], [], []>} : vector<8x32xf32>, vector<32x128xf32>, vector<8x128xf32> -> vector<8x128xf32>
    %139 = arith.addf %137, %138 : vector<8x128xf32>
    %140 = arith.negf %139 : vector<8x128xf32>
    %141 = math.exp %140 : vector<8x128xf32>
    %cst_47 = arith.constant 1.000000e+00 : f32
    %142 = vector.broadcast %cst_47 : f32 to vector<8x128xf32>
    %143 = arith.addf %142, %141 : vector<8x128xf32>
    %144 = arith.divf %142, %143 : vector<8x128xf32>
    %145 = vector.extract_strided_slice %139 {offsets = [0, 64], sizes = [8, 32], strides = [1, 1]} : vector<8x128xf32> to vector<8x32xf32>
    %146 = math.tanh %145 : vector<8x32xf32>
    %147 = vector.extract_strided_slice %144 {offsets = [0, 32], sizes = [8, 32], strides = [1, 1]} : vector<8x128xf32> to vector<8x32xf32>
    %148 = arith.mulf %147, %126 : vector<8x32xf32>
    %149 = vector.extract_strided_slice %144 {offsets = [0, 0], sizes = [8, 32], strides = [1, 1]} : vector<8x128xf32> to vector<8x32xf32>
    %150 = arith.mulf %149, %146 : vector<8x32xf32>
    %151 = arith.addf %148, %150 : vector<8x32xf32>
    %152 = vector.extract_strided_slice %144 {offsets = [0, 96], sizes = [8, 32], strides = [1, 1]} : vector<8x128xf32> to vector<8x32xf32>
    %153 = math.tanh %151 : vector<8x32xf32>
    %154 = arith.mulf %152, %153 : vector<8x32xf32>
    %c5 = arith.constant 5 : index
    %c0_48 = arith.constant 0 : index
    %c0_49 = arith.constant 0 : index
    %155 = vector.load %arg9[%c5, %c0_48, %c0_49] : memref<8x8x32xf32, #tpu.memory_space<vmem>>, vector<1x8x32xf32>
    %156 = vector.shape_cast %155 : vector<1x8x32xf32> to vector<8x32xf32>
    %157 = vector.shape_cast %154 : vector<8x32xf32> to vector<1x8x32xf32>
    tpu.vector_store %arg9[%c5, %c0_48, %c0_49], %157 {strides = array<i32>} : memref<8x8x32xf32, #tpu.memory_space<vmem>>, vector<1x8x32xf32>,
    %cst_50 = arith.constant dense<0.000000e+00> : vector<8x544xf32>
    %158 = tpu.matmul %154, %8, %cst_50 {dimension_numbers = #tpu.dot_dimension_numbers<[1], [0], [0], [1], [0, 0, 1, 1], [], []>} : vector<8x32xf32>, vector<32x544xf32>, vector<8x544xf32> -> vector<8x544xf32>
    %159 = vector.broadcast %9 : vector<1x544xf32> to vector<8x544xf32>
    %160 = arith.addf %158, %159 : vector<8x544xf32>
    %c40 = arith.constant 40 : index
    %c0_51 = arith.constant 0 : index
    %161 = vector.load %arg11[%c40, %c0_51] : memref<64x544xf32, #tpu.memory_space<vmem>>, vector<8x544xf32>
    tpu.vector_store %arg11[%c40, %c0_51], %160 {strides = array<i32>} : memref<64x544xf32, #tpu.memory_space<vmem>>, vector<8x544xf32>,
    %162 = vector.extract_strided_slice %6 {offsets = [48, 0], sizes = [8, 128], strides = [1, 1]} : vector<64x128xf32> to vector<8x128xf32>
    %cst_52 = arith.constant dense<0.000000e+00> : vector<8x128xf32>
    %163 = tpu.matmul %154, %7, %cst_52 {dimension_numbers = #tpu.dot_dimension_numbers<[1], [0], [0], [1], [0, 0, 1, 1], [], []>} : vector<8x32xf32>, vector<32x128xf32>, vector<8x128xf32> -> vector<8x128xf32>
    %164 = arith.addf %162, %163 : vector<8x128xf32>
    %165 = arith.negf %164 : vector<8x128xf32>
    %166 = math.exp %165 : vector<8x128xf32>
    %cst_53 = arith.constant 1.000000e+00 : f32
    %167 = vector.broadcast %cst_53 : f32 to vector<8x128xf32>
    %168 = arith.addf %167, %166 : vector<8x128xf32>
    %169 = arith.divf %167, %168 : vector<8x128xf32>
    %170 = vector.extract_strided_slice %164 {offsets = [0, 64], sizes = [8, 32], strides = [1, 1]} : vector<8x128xf32> to vector<8x32xf32>
    %171 = math.tanh %170 : vector<8x32xf32>
    %172 = vector.extract_strided_slice %169 {offsets = [0, 32], sizes = [8, 32], strides = [1, 1]} : vector<8x128xf32> to vector<8x32xf32>
    %173 = arith.mulf %172, %151 : vector<8x32xf32>
    %174 = vector.extract_strided_slice %169 {offsets = [0, 0], sizes = [8, 32], strides = [1, 1]} : vector<8x128xf32> to vector<8x32xf32>
    %175 = arith.mulf %174, %171 : vector<8x32xf32>
    %176 = arith.addf %173, %175 : vector<8x32xf32>
    %177 = vector.extract_strided_slice %169 {offsets = [0, 96], sizes = [8, 32], strides = [1, 1]} : vector<8x128xf32> to vector<8x32xf32>
    %178 = math.tanh %176 : vector<8x32xf32>
    %179 = arith.mulf %177, %178 : vector<8x32xf32>
    %c6 = arith.constant 6 : index
    %c0_54 = arith.constant 0 : index
    %c0_55 = arith.constant 0 : index
    %180 = vector.load %arg9[%c6, %c0_54, %c0_55] : memref<8x8x32xf32, #tpu.memory_space<vmem>>, vector<1x8x32xf32>
    %181 = vector.shape_cast %180 : vector<1x8x32xf32> to vector<8x32xf32>
    %182 = vector.shape_cast %179 : vector<8x32xf32> to vector<1x8x32xf32>
    tpu.vector_store %arg9[%c6, %c0_54, %c0_55], %182 {strides = array<i32>} : memref<8x8x32xf32, #tpu.memory_space<vmem>>, vector<1x8x32xf32>,
    %cst_56 = arith.constant dense<0.000000e+00> : vector<8x544xf32>
    %183 = tpu.matmul %179, %8, %cst_56 {dimension_numbers = #tpu.dot_dimension_numbers<[1], [0], [0], [1], [0, 0, 1, 1], [], []>} : vector<8x32xf32>, vector<32x544xf32>, vector<8x544xf32> -> vector<8x544xf32>
    %184 = vector.broadcast %9 : vector<1x544xf32> to vector<8x544xf32>
    %185 = arith.addf %183, %184 : vector<8x544xf32>
    %c48 = arith.constant 48 : index
    %c0_57 = arith.constant 0 : index
    %186 = vector.load %arg11[%c48, %c0_57] : memref<64x544xf32, #tpu.memory_space<vmem>>, vector<8x544xf32>
    tpu.vector_store %arg11[%c48, %c0_57], %185 {strides = array<i32>} : memref<64x544xf32, #tpu.memory_space<vmem>>, vector<8x544xf32>,
    %187 = vector.extract_strided_slice %6 {offsets = [56, 0], sizes = [8, 128], strides = [1, 1]} : vector<64x128xf32> to vector<8x128xf32>
    %cst_58 = arith.constant dense<0.000000e+00> : vector<8x128xf32>
    %188 = tpu.matmul %179, %7, %cst_58 {dimension_numbers = #tpu.dot_dimension_numbers<[1], [0], [0], [1], [0, 0, 1, 1], [], []>} : vector<8x32xf32>, vector<32x128xf32>, vector<8x128xf32> -> vector<8x128xf32>
    %189 = arith.addf %187, %188 : vector<8x128xf32>
    %190 = arith.negf %189 : vector<8x128xf32>
    %191 = math.exp %190 : vector<8x128xf32>
    %cst_59 = arith.constant 1.000000e+00 : f32
    %192 = vector.broadcast %cst_59 : f32 to vector<8x128xf32>
    %193 = arith.addf %192, %191 : vector<8x128xf32>
    %194 = arith.divf %192, %193 : vector<8x128xf32>
    %195 = vector.extract_strided_slice %189 {offsets = [0, 64], sizes = [8, 32], strides = [1, 1]} : vector<8x128xf32> to vector<8x32xf32>
    %196 = math.tanh %195 : vector<8x32xf32>
    %197 = vector.extract_strided_slice %194 {offsets = [0, 32], sizes = [8, 32], strides = [1, 1]} : vector<8x128xf32> to vector<8x32xf32>
    %198 = arith.mulf %197, %176 : vector<8x32xf32>
    %199 = vector.extract_strided_slice %194 {offsets = [0, 0], sizes = [8, 32], strides = [1, 1]} : vector<8x128xf32> to vector<8x32xf32>
    %200 = arith.mulf %199, %196 : vector<8x32xf32>
    %201 = arith.addf %198, %200 : vector<8x32xf32>
    %202 = vector.extract_strided_slice %194 {offsets = [0, 96], sizes = [8, 32], strides = [1, 1]} : vector<8x128xf32> to vector<8x32xf32>
    %203 = math.tanh %201 : vector<8x32xf32>
    %204 = arith.mulf %202, %203 : vector<8x32xf32>
    %c7 = arith.constant 7 : index
    %c0_60 = arith.constant 0 : index
    %c0_61 = arith.constant 0 : index
    %205 = vector.load %arg9[%c7, %c0_60, %c0_61] : memref<8x8x32xf32, #tpu.memory_space<vmem>>, vector<1x8x32xf32>
    %206 = vector.shape_cast %205 : vector<1x8x32xf32> to vector<8x32xf32>
    %207 = vector.shape_cast %204 : vector<8x32xf32> to vector<1x8x32xf32>
    tpu.vector_store %arg9[%c7, %c0_60, %c0_61], %207 {strides = array<i32>} : memref<8x8x32xf32, #tpu.memory_space<vmem>>, vector<1x8x32xf32>,
    %cst_62 = arith.constant dense<0.000000e+00> : vector<8x544xf32>
    %208 = tpu.matmul %204, %8, %cst_62 {dimension_numbers = #tpu.dot_dimension_numbers<[1], [0], [0], [1], [0, 0, 1, 1], [], []>} : vector<8x32xf32>, vector<32x544xf32>, vector<8x544xf32> -> vector<8x544xf32>
    %209 = vector.broadcast %9 : vector<1x544xf32> to vector<8x544xf32>
    %210 = arith.addf %208, %209 : vector<8x544xf32>
    %c56 = arith.constant 56 : index
    %c0_63 = arith.constant 0 : index
    %211 = vector.load %arg11[%c56, %c0_63] : memref<64x544xf32, #tpu.memory_space<vmem>>, vector<8x544xf32>
    tpu.vector_store %arg11[%c56, %c0_63], %210 {strides = array<i32>} : memref<64x544xf32, #tpu.memory_space<vmem>>, vector<8x544xf32>,
    %c0_64 = arith.constant 0 : index
    %c0_65 = arith.constant 0 : index
    %212 = vector.load %arg11[%c0_64, %c0_65] : memref<64x544xf32, #tpu.memory_space<vmem>>, vector<64x544xf32>
    %213 = vector.extract_strided_slice %212 {offsets = [0, 0], sizes = [64, 32], strides = [1, 1]} : vector<64x544xf32> to vector<64x32xf32>
    %214 = vector.extract_strided_slice %212 {offsets = [0, 32], sizes = [64, 32], strides = [1, 1]} : vector<64x544xf32> to vector<64x32xf32>
    %215 = vector.extract_strided_slice %212 {offsets = [0, 64], sizes = [64, 32], strides = [1, 1]} : vector<64x544xf32> to vector<64x32xf32>
    %216 = vector.extract_strided_slice %212 {offsets = [0, 96], sizes = [64, 32], strides = [1, 1]} : vector<64x544xf32> to vector<64x32xf32>
    %217 = vector.extract_strided_slice %212 {offsets = [0, 128], sizes = [64, 32], strides = [1, 1]} : vector<64x544xf32> to vector<64x32xf32>
    %218 = arith.maximumf %213, %214 : vector<64x32xf32>
    %219 = arith.maximumf %218, %215 : vector<64x32xf32>
    %220 = arith.maximumf %219, %216 : vector<64x32xf32>
    %221 = arith.maximumf %220, %217 : vector<64x32xf32>
    %cst_66 = arith.constant 0.000000e+00 : f32
    %222 = vector.broadcast %cst_66 : f32 to vector<64x32xf32>
    %223 = arith.subf %213, %221 : vector<64x32xf32>
    %224 = math.exp %223 : vector<64x32xf32>
    %225 = arith.addf %222, %224 : vector<64x32xf32>
    %226 = arith.subf %214, %221 : vector<64x32xf32>
    %227 = math.exp %226 : vector<64x32xf32>
    %228 = arith.addf %225, %227 : vector<64x32xf32>
    %229 = arith.subf %215, %221 : vector<64x32xf32>
    %230 = math.exp %229 : vector<64x32xf32>
    %231 = arith.addf %228, %230 : vector<64x32xf32>
    %232 = arith.subf %216, %221 : vector<64x32xf32>
    %233 = math.exp %232 : vector<64x32xf32>
    %234 = arith.addf %231, %233 : vector<64x32xf32>
    %235 = arith.subf %217, %221 : vector<64x32xf32>
    %236 = math.exp %235 : vector<64x32xf32>
    %237 = arith.addf %234, %236 : vector<64x32xf32>
    %238 = math.log %237 : vector<64x32xf32>
    %239 = arith.addf %221, %238 : vector<64x32xf32>
    %240 = arith.subf %213, %239 : vector<64x32xf32>
    %241 = arith.subf %214, %239 : vector<64x32xf32>
    %242 = arith.subf %215, %239 : vector<64x32xf32>
    %243 = arith.subf %216, %239 : vector<64x32xf32>
    %244 = arith.subf %217, %239 : vector<64x32xf32>
    %245 = tpu.concatenate %240, %241, %242, %243, %244 in 1 : vector<64x32xf32>, vector<64x32xf32>, vector<64x32xf32>, vector<64x32xf32>, vector<64x32xf32> -> vector<64x160xf32>
    %246 = vector.extract_strided_slice %212 {offsets = [0, 480], sizes = [64, 64], strides = [1, 1]} : vector<64x544xf32> to vector<64x64xf32>
    %cst_67 = arith.constant 0.000000e+00 : f32
    %247 = vector.broadcast %cst_67 : f32 to vector<64x64xf32>
    %248 = arith.maximumf %246, %247 : vector<64x64xf32>
    %c0_68 = arith.constant 0 : index
    %c0_69 = arith.constant 0 : index
    %249 = vector.load %arg7[%c0_68, %c0_69] : memref<64x32xf32, #tpu.memory_space<vmem>>, vector<64x32xf32>
    %cst_70 = arith.constant dense<0.000000e+00> : vector<64x32xf32>
    %250 = tpu.matmul %248, %249, %cst_70 {dimension_numbers = #tpu.dot_dimension_numbers<[1], [0], [0], [1], [0, 0, 1, 1], [], []>} : vector<64x64xf32>, vector<64x32xf32>, vector<64x32xf32> -> vector<64x32xf32>
    %c0_71 = arith.constant 0 : index
    %c0_72 = arith.constant 0 : index
    %251 = vector.load %arg8[%c0_71, %c0_72] : memref<1x32xf32, #tpu.memory_space<vmem>>, vector<1x32xf32>
    %252 = vector.broadcast %251 : vector<1x32xf32> to vector<64x32xf32>
    %253 = arith.addf %250, %252 : vector<64x32xf32>
    %254 = vector.extract_strided_slice %212 {offsets = [0, 160], sizes = [64, 320], strides = [1, 1]} : vector<64x544xf32> to vector<64x320xf32>
    %255 = tpu.concatenate %245, %254, %253 in 1 : vector<64x160xf32>, vector<64x320xf32>, vector<64x32xf32> -> vector<64x512xf32>
    %256 = vector.shape_cast %255 : vector<64x512xf32> to vector<8x8x512xf32>
    %c0_73 = arith.constant 0 : index
    %c0_74 = arith.constant 0 : index
    %c0_75 = arith.constant 0 : index
    %257 = vector.load %arg10[%c0_73, %c0_74, %c0_75] : memref<8x8x512xf32, #tpu.memory_space<vmem>>, vector<8x8x512xf32>
    tpu.vector_store %arg10[%c0_73, %c0_74, %c0_75], %256 {strides = array<i32>} : memref<8x8x512xf32, #tpu.memory_space<vmem>>, vector<8x8x512xf32>,
    return
  }
  func.func @transform_0(%arg0: i32) -> (i32, i32, i32) {
    %c0_i32 = arith.constant 0 : i32
    %c0_i32_0 = arith.constant 0 : i32
    %c0_i32_1 = arith.constant 0 : i32
    return %c0_i32, %arg0, %c0_i32_0 : i32, i32, i32
  }
  func.func @transform_1(%arg0: i32) -> (i32, i32) {
    %c0_i32 = arith.constant 0 : i32
    %c0_i32_0 = arith.constant 0 : i32
    %c0_i32_1 = arith.constant 0 : i32
    return %c0_i32, %c0_i32_0 : i32, i32
  }
  func.func @transform_2(%arg0: i32) -> (i32, i32) {
    %c0_i32 = arith.constant 0 : i32
    %c0_i32_0 = arith.constant 0 : i32
    %c0_i32_1 = arith.constant 0 : i32
    return %c0_i32, %c0_i32_0 : i32, i32
  }
  func.func @transform_3(%arg0: i32) -> (i32, i32) {
    %c0_i32 = arith.constant 0 : i32
    %c0_i32_0 = arith.constant 0 : i32
    %c0_i32_1 = arith.constant 0 : i32
    return %c0_i32, %c0_i32_0 : i32, i32
  }
  func.func @transform_4(%arg0: i32) -> (i32, i32) {
    %c0_i32 = arith.constant 0 : i32
    %c0_i32_0 = arith.constant 0 : i32
    %c0_i32_1 = arith.constant 0 : i32
    return %c0_i32, %c0_i32_0 : i32, i32
  }
  func.func @transform_5(%arg0: i32) -> (i32, i32) {
    %c0_i32 = arith.constant 0 : i32
    %c0_i32_0 = arith.constant 0 : i32
    %c0_i32_1 = arith.constant 0 : i32
    return %c0_i32, %c0_i32_0 : i32, i32
  }
  func.func @transform_6(%arg0: i32) -> (i32, i32) {
    %c0_i32 = arith.constant 0 : i32
    %c0_i32_0 = arith.constant 0 : i32
    %c0_i32_1 = arith.constant 0 : i32
    return %c0_i32, %c0_i32_0 : i32, i32
  }
  func.func @transform_7(%arg0: i32) -> (i32, i32) {
    %c0_i32 = arith.constant 0 : i32
    %c0_i32_0 = arith.constant 0 : i32
    %c0_i32_1 = arith.constant 0 : i32
    return %c0_i32, %c0_i32_0 : i32, i32
  }
  func.func @transform_8(%arg0: i32) -> (i32, i32, i32) {
    %c0_i32 = arith.constant 0 : i32
    %c0_i32_0 = arith.constant 0 : i32
    %c0_i32_1 = arith.constant 0 : i32
    return %c0_i32, %arg0, %c0_i32_0 : i32, i32, i32
  }
  func.func @transform_9(%arg0: i32) -> (i32, i32, i32) {
    %c0_i32 = arith.constant 0 : i32
    %c0_i32_0 = arith.constant 0 : i32
    %c0_i32_1 = arith.constant 0 : i32
    return %c0_i32, %arg0, %c0_i32_0 : i32, i32, i32
  }
}

</mosaic_0001>

<bundles_post_ra>
// kernel: rnn_forward.1
= control target key start
LH: loop header
LB: loop body
LE: loop exit
PB: predicated region body
PF: predicated region fallthrough
CT: control target
= control target key end

     0   :  { %15 = vsyncpa [#allocation4], 0  ;;  %s4215_s0 = inlined_call_operand.vmem [shape: f32[8,8,34], index: 0, kind: input, shape index: {}]   ;;  %s4216_s1 = inlined_call_operand.hbm [shape: f32[34,128], index: 1, kind: input, shape index: {}]   ;;  %s4217_s2 = inlined_call_operand.vmem [shape: f32[32,128], index: 2, kind: input, shape index: {}]   ;;  %s4218_s3 = inlined_call_operand.hbm [shape: f32[1,128], index: 3, kind: input, shape index: {}]   ;;  %s4219_s4 = inlined_call_operand.vmem [shape: f32[32,544], index: 4, kind: input, shape index: {}]   ;;  %s4220_s5 = inlined_call_operand.hbm [shape: f32[1,544], index: 5, kind: input, shape index: {}]   ;;  %s4221_s6 = inlined_call_operand.vmem [shape: f32[64,32], index: 6, kind: input, shape index: {}]   ;;  %s4222_s7 = inlined_call_operand.vmem [shape: f32[1,32], index: 7, kind: input, shape index: {}]   ;;  %s4223_s8 = inlined_call_operand.vmem [shape: f32[8,8,32], index: 8, kind: output, shape index: {0}]   ;;  %s4224_s9 = inlined_call_operand.vmem [shape: f32[8,8,512], index: 9, kind: output, shape index: {1}]  }
   0x1   :  { %16 = vsyncpa [#allocation6], 0  ;;  %s39_s11 = sshll.u32 %s4218_s3, 4  ;;  %s2855_s12 = smov [#allocation5]   ;;  %s40_s11 = int_to_ptr.hbm [resolvable:$true] %s39_s11 }
   0x2   :  { %s41_s13 = sshll.u32 %s2855_s12, 4  ;;  %s23_s16 = sshll.u32 %s4216_s1, 4  ;;  %s42_s13 = int_to_ptr.vmem [resolvable:$true] %s41_s13  ;;  %s24_s16 = int_to_ptr.hbm [resolvable:$true] %s23_s16 }
   0x3   :  { %44 = dma.hbm_to_vmem [thread:$0]  %s40_s11, 16, %s42_s13, [#allocation6]  }
   0x4   :  { %s2856_s17 = smov [#allocation3]   ;;  %s2857_s19 = smov 128  }
   0x5   :  { %s25_s18 = sshll.u32 %s2856_s17, 4  ;;  %s2858_s20 = smov 8   ;;  %s26_s18 = int_to_ptr.vmem [resolvable:$true] %s25_s18 }
   0x6   :  { %31 = dma.hbm_to_vmem [thread:$0]  %s24_s16, 640, %s26_s18, [#allocation4], %s2857_s19, %s2857_s19, %s2858_s20  }
   0x7   :  { %s52_s3 = sshll.u32 %s4220_s5, 4  ;;  %s2859_s23 = smov [#allocation7]   ;;  %s53_s3 = int_to_ptr.hbm [resolvable:$true] %s52_s3 }
   0x8   :  { %s54_s24 = sshll.u32 %s2859_s23, 4  ;;  %s55_s24 = int_to_ptr.vmem [resolvable:$true] %s54_s24 }
   0x9   :  { %57 = dma.hbm_to_vmem [thread:$0]  %s53_s3, 80, %s55_s24, [#allocation6]  }
   0xa   :  { %2851 = dma.done.wait [#allocation4], 640  }
   0xb   :  { %2852 = vsyncadd [#allocation4], 4294966656 }
   0xc   :  { %2853 = dma.done.wait [#allocation6], 96  }
   0xd   :  { %2854 = vsyncadd [#allocation6], 4294967200  ;;  %vm116_vm0 = vcmask 1041408   ;;  %v86_v0 = vld [vmem:[#allocation3 + $0x20] sm:$0x3]  ;;  %v85_v1 = vld [vmem:[#allocation3 + $0x18] sm:$0xff] }
   0xe   :  { %2457 = vmatpush.msk.msra.mxu0 %vm116_vm0, %v86_v0  ;;  %v2926_v2 = vld [vmem:[%s4217_s2 + $0x18] sm:$0xff]  ;;  %v2931_v3 = vld [vmem:[%s4217_s2 + $0x10] sm:$0xff]  ;;  %v2937_v5 = vld [vmem:[%s4217_s2 + $0x8] sm:$0xff]  ;;  %vm91_vm1 = vcmask 277504   ;;  %v2860_v10 = vmov 0.0   ;;  %s2861_s12 = smov 64  }
   0xf   :  { %v84_v4 = vld [vmem:[#allocation3 + $0x10] sm:$0xff]  ;;  %202 = vmatpush.msra.mxu1 %v2926_v2  ;;  %v83_v6 = vld [vmem:[#allocation3 + $0x8] sm:$0xff]  ;;  %v2943_v7 = vld [vmem:[%s4217_s2] sm:$0xff]  ;;  %s2862_s13 = smov 32   ;;  %vm186_vm6 = vcmask 261120  }
  0x10   :  { %132 = vmatpush.msra.mxu0 %v85_v1  ;;  %v82_v8 = vld [vmem:[#allocation3] sm:$0xff]  ;;  %v2951_v11 = vld [vmem:[#allocation5] ss:$0 sm:$0xff]  ;;  %v2968_v37 = vld [vmem:[%s4219_s4 + $0x78] sm:$0xff] }
  0x11   :  { %203 = vmatpush.msra.mxu1 %v2931_v3  ;;  %v74_v9 = vld [vmem:[%s4215_s0] sm:$0xff]  ;;  %v2963_v36 = vld [vmem:[%s4219_s4 + $0x88] sm:$0xff]  ;;  %278 = vmatpush.msra.mxu2 %v2968_v37  ;;  %v2985_v40 = vld [vmem:[%s4219_s4 + $0x50] sm:$0xff] }
  0x12   :  { %133 = vmatpush.msra.mxu0 %v84_v4  ;;  %v2973_v38 = vld [vmem:[%s4219_s4 + $0x80] sm:$0xff]  ;;  %v2990_v41 = vld [vmem:[%s4219_s4 + $0x58] sm:$0xff]  ;;  %v3001_v43 = vld [vmem:[%s4219_s4 + $0x28] sm:$0xff] }
  0x13   :  { %204 = vmatpush.msra.mxu1 %v2937_v5  ;;  %v2980_v39 = vld [vmem:[%s4219_s4 + $0x60] sm:$0xff]  ;;  %298 = vmatpush.msra.mxu3 %v2973_v38  ;;  %v2996_v42 = vld [vmem:[%s4219_s4 + $0x38] sm:$0xff]  ;;  %v3009_v44 = vld [vmem:[%s4219_s4 + $0x30] sm:$0xff] }
  0x14   :  { %134 = vmatpush.msra.mxu0 %v83_v6  ;;  %279 = vmatpush.msra.mxu2 %v2985_v40  ;;  %v3015_v45 = vld [vmem:[%s4219_s4 + $0x10] sm:$0xff]  ;;  %v3020_v46 = vld [vmem:[%s4219_s4] sm:$0xff]  ;;  %v3028_v47 = vld [vmem:[%s4219_s4 + $0x8] sm:$0xff] }
  0x15   :  { %205 = vmatpush.msra.mxu1 %v2943_v7  ;;  %299 = vmatpush.msra.mxu3 %v2990_v41  ;;  %v3048_v50 = vld [vmem:[%s4219_s4 + $0x90] sm:$0xff]  ;;  %v3053_v51 = vld [vmem:[%s4219_s4 + $0x98] sm:$0xff]  ;;  %v3058_v52 = vld [vmem:[%s4219_s4 + $0x68] sm:$0xff] }
  0x16   :  { %135 = vmatpush.msra.mxu0 %v82_v8  ;;  %206 = vmatmul.f32.vlgmr.msra.gmra.mxu1 %v2860_v10  ;;  %v3065_v53 = vld [vmem:[%s4219_s4 + $0x70] sm:$0xff]  ;;  %v3070_v54 = vld [vmem:[%s4219_s4 + $0x40] sm:$0xff]  ;;  %v3075_v55 = vld [vmem:[%s4219_s4 + $0x48] sm:$0xff] }
  0x17   :  { %2458 = vmatmul.msk.f32.vlgmr.msra.gmra.mxu0 %vm91_vm1, %v74_v9  ;;  %318 = vmatpush.msrb.mxu1 %v2963_v36  ;;  %v75_v56 = vld [vmem:[%s4215_s0 + $0x8] sm:$0xff]  ;;  %v3086_v57 = vld [vmem:[%s4219_s4 + $0x18] sm:$0xff]  ;;  %v3091_v58 = vld [vmem:[%s4219_s4 + $0x20] sm:$0xff] }
  0x18   :  { %1002 = vmatpush.msrb.mxu0 %v2963_v36  ;;  %280 = vmatpush.msra.mxu2 %v3001_v43  ;;  %v185_v60 = vld [vmem:[#allocation7] sm:$0x1f] }
  0x19   :  { %319 = vmatpush.msrb.mxu1 %v2980_v39  ;;  %300 = vmatpush.msra.mxu3 %v3009_v44  ;;  %v3131_v61 = vperm.slane %v185_v60, 2  ;;  %v3134_v1 = vperm.slane %v185_v60, 0  ;;  %v3136_v4 = vperm.slane %v185_v60, 1 }
  0x1a   :  { %1003 = vmatpush.msrb.mxu0 %v2980_v39  ;;  %281 = vmatpush.msra.mxu2 %v3020_v46 }
  0x1b   :  { %320 = vmatpush.msrb.mxu1 %v2996_v42  ;;  %301 = vmatpush.msra.mxu3 %v3028_v47 }
  0x1c   :  { %1004 = vmatpush.msrb.mxu0 %v2996_v42  ;;  %338 = vmatpush.msrb.mxu2 %v3048_v50 }
  0x1d   :  { %321 = vmatpush.msrb.mxu1 %v3015_v45  ;;  %358 = vmatpush.msrb.mxu3 %v3053_v51 }
  0x1e   :  { %1005 = vmatpush.msrb.mxu0 %v3015_v45  ;;  %339 = vmatpush.msrb.mxu2 %v3058_v52 }
  0x1f   :  { %383 = vmatpush.msra.mxu1 %v2926_v2  ;;  %359 = vmatpush.msrb.mxu3 %v3065_v53 }
  0x20   :  { %1133 = vmatpush.msra.mxu0 %v2968_v37  ;;  %340 = vmatpush.msrb.mxu2 %v3070_v54 }
  0x21   :  { %384 = vmatpush.msra.mxu1 %v2931_v3  ;;  %2459 = vmatmul.msk.f32.gmra.mxu0 %vm91_vm1, %v75_v56 }
  0x22   :  { %1134 = vmatpush.msra.mxu0 %v2985_v40  ;;  %360 = vmatpush.msrb.mxu3 %v3075_v55 }
  0x23   :  { %385 = vmatpush.msra.mxu1 %v2937_v5  ;;  %341 = vmatpush.msrb.mxu2 %v3086_v57 }
  0x24   :  { %1135 = vmatpush.msra.mxu0 %v3001_v43  ;;  %361 = vmatpush.msrb.mxu3 %v3091_v58 }
  0x25   :  { %386 = vmatpush.msra.mxu1 %v2943_v7 }
  0x26   :  { %1136 = vmatpush.msra.mxu0 %v3020_v46 }
  0x93   :  { %v207_v13 = vpop.f32.mrf.mxu1 }
  0x94   :  { %v137_v12 = vpop.f32.mrf.mxu0 }
  0x95   :  { %v138_v14 = vadd.f32 %v2951_v11, %v137_v12 }
  0x97   :  { %v210_v15 = vadd.f32 %v207_v13, %v138_v14 }
  0x99   :  { %2571 = vtanh.f32 %v210_v15  ;;  %v2466_v17 = vmul.f32 -1.442695, %v210_v15  ;;  %v3144_v15 = vperm.slane %v185_v60, 3 }
  0x9b   :  { %2573 = vpow2.f32 %v2466_v17 }
  0x9e   :  { %v140_v0 = vpop.f32.mrf.mxu0 }
  0x9f   :  { %v2572_v16 = vpop.eup %2571  ;;  %v141_v6 = vadd.f32 %v2951_v11, %v140_v0 }
  0xa0   :  { %233 = vrot.lane.b32.xlu0 %v2572_v16, %s2861_s12  ;;  %v3146_v16 = vperm.slane %v185_v60, 4 }
  0xa1   :  { %v2574_v18 = vpop.eup %2573 }
  0xa2   :  { %v214_v19 = vadd.f32 1.0, %v2574_v18 }
  0xa4   :  { %2575 = vrcp.f32 %v214_v19  ;;  %v226_v25 = vand.u32 2147483648, %v214_v19  ;;  %vm220_vm3 = vweird.f32 %v214_v19  ;;  %v224_v26 = vand.u32 2147483647, %v214_v19 }
  0xa6   :  { %v227_v28 = vor.u32 1.1754944e-38, %v226_v25  ;;  %vm225_vm5 = vcmp.eq.f32.partialorder %v224_v26, 8.507059e+37 }
  0xaa   :  { %v2576_v20 = vpop.eup %2575 }
  0xab   :  { %v216_v21 = vmul.f32 %v2576_v20, %v214_v19  ;;  %vm221_vm2 = vweird.f32 %v2576_v20 }
  0xac   :  { %vm222_vm4 = vmor %vm220_vm3, %vm221_vm2 }
  0xad   :  { %v217_v22 = vsub.f32 1.0, %v216_v21 }
  0xaf   :  { %v218_v23 = vmul.f32 %v2576_v20, %v217_v22 }
  0xb1   :  { %v219_v24 = vadd.f32 %v2576_v20, %v218_v23 }
  0xb3   :  { %v223_v27 = vsel %vm222_vm4, %v2576_v20, %v219_v24 }
  0xb4   :  { %v228_v30 = vsel %vm225_vm5, %v227_v28, %v223_v27 }
  0xb5   :  { %v231_v32 = vmul.f32 0.0, %v228_v30 }
 0x112   :  { %v234_v29 = vpop.permute.xlu0 %233 }
 0x113   :  { %v236_v31 = vmul.f32 %v234_v29, %v228_v30 }
 0x115   :  { %238 = vrot.lane.b32.xlu0 %v236_v31, %s2862_s13 }
 0x187   :  { %v239_v33 = vpop.permute.xlu0 %238 }
 0x188   :  { %v2956_v34 = vadd.f32 %v239_v33, %v231_v32 }
 0x18a   :  { %2577 = vtanh.f32 %v2956_v34 }
 0x190   :  { %v2578_v35 = vpop.eup %2577 }
 0x191   :  { %244 = vrot.lane.b32.xlu1 %v2578_v35, %s2861_s12 }
 0x203   :  { %v245_v48 = vpop.permute.xlu1 %244 }
 0x204   :  { %v247_v49 = vmul.f32 %v245_v48, %v228_v30 }
 0x206   :  { %249 = vrot.lane.b32.xlu1 %v247_v49, %s2862_s13 }
 0x278   :  { %v250_v59 = vpop.permute.xlu1 %249 }
 0x279   :  { %252 = vst.msk [vmem:[%s4223_s8] sm:$0xff] %vm186_vm6, %v250_v59  ;;  %2467 = vmatmul.msk.f32.vlgmr.msra.gmra.mxu2 %vm186_vm6, %v250_v59  ;;  %2468 = vmatmul.msk.f32.vlgmr.msra.gmra.mxu3 %vm186_vm6, %v250_v59 }
 0x27a   :  { %2469 = vmatmul.msk.f32.vlgmr.msrb.gmra.mxu1 %vm186_vm6, %v250_v59  ;;  %449 = vmatpush.msra.mxu2 %v2968_v37 }
 0x27b   :  { %489 = vmatpush.msrb.mxu1 %v2963_v36  ;;  %469 = vmatpush.msra.mxu3 %v2973_v38 }
 0x27c   :  { %450 = vmatpush.msra.mxu2 %v2985_v40 }
 0x27d   :  { %490 = vmatpush.msrb.mxu1 %v2980_v39  ;;  %470 = vmatpush.msra.mxu3 %v2990_v41 }
 0x27e   :  { %451 = vmatpush.msra.mxu2 %v3001_v43 }
 0x27f   :  { %491 = vmatpush.msrb.mxu1 %v2996_v42  ;;  %471 = vmatpush.msra.mxu3 %v3009_v44 }
 0x280   :  { %452 = vmatpush.msra.mxu2 %v3020_v46 }
 0x281   :  { %2470 = vmatmul.msk.f32.vlgmr.msrb.gmra.mxu2 %vm186_vm6, %v250_v59  ;;  %2471 = vmatmul.msk.f32.vlgmr.msrb.gmra.mxu3 %vm186_vm6, %v250_v59 }
 0x282   :  { %2472 = vmatmul.msk.f32.vlgmr.msra.gmra.mxu1 %vm186_vm6, %v250_v59  ;;  %472 = vmatpush.msra.mxu3 %v3028_v47 }
 0x283   :  { %492 = vmatpush.msrb.mxu1 %v3015_v45  ;;  %509 = vmatpush.msrb.mxu2 %v3048_v50 }
 0x284   :  { %529 = vmatpush.msrb.mxu3 %v3053_v51 }
 0x285   :  { %554 = vmatpush.msra.mxu1 %v2926_v2  ;;  %510 = vmatpush.msrb.mxu2 %v3058_v52 }
 0x286   :  { %530 = vmatpush.msrb.mxu3 %v3065_v53 }
 0x287   :  { %555 = vmatpush.msra.mxu1 %v2931_v3  ;;  %511 = vmatpush.msrb.mxu2 %v3070_v54 }
 0x288   :  { %531 = vmatpush.msrb.mxu3 %v3075_v55 }
 0x289   :  { %556 = vmatpush.msra.mxu1 %v2937_v5  ;;  %512 = vmatpush.msrb.mxu2 %v3086_v57 }
 0x28a   :  { %532 = vmatpush.msrb.mxu3 %v3091_v58 }
 0x28b   :  { %557 = vmatpush.msra.mxu1 %v2943_v7 }
 0x2f7   :  { %v323_v62 = vpop.f32.mrf.mxu1 }
 0x2f8   :  { %v324_v63 = vadd.f32 %v323_v62, %v3131_v61 }
 0x2fa   :  { %2417 = vst [vmem:[%s4224_s9 + $0x10] sm:$0xff] %v324_v63 }
 0x2fc   :  { %v283_v8 = vpop.f32.mrf.mxu2  ;;  %v303_v9 = vpop.f32.mrf.mxu3 }
 0x2fd   :  { %v284_v10 = vadd.f32 %v283_v8, %v3134_v1  ;;  %v304_v12 = vadd.f32 %v303_v9, %v3136_v4 }
 0x2ff   :  { %366 = vst [vmem:[#allocation2] sm:$0xff] %v284_v10  ;;  %v388_v13 = vpop.f32.mrf.mxu1 }
 0x300   :  { %367 = vst [vmem:[#allocation2 + $0x8] sm:$0xff] %v304_v12  ;;  %v391_v14 = vadd.f32 %v388_v13, %v141_v6  ;;  %v76_v6 = vld [vmem:[%s4215_s0 + $0x10] sm:$0xff] }
 0x301   :  { %2460 = vmatmul.msk.f32.gmra.mxu0 %vm91_vm1, %v76_v6 }
 0x302   :  { %2579 = vtanh.f32 %v391_v14  ;;  %v2473_v22 = vmul.f32 -1.442695, %v391_v14 }
 0x304   :  { %v343_v17 = vpop.f32.mrf.mxu2  ;;  %v363_v18 = vpop.f32.mrf.mxu3  ;;  %2581 = vpow2.f32 %v2473_v22 }
 0x305   :  { %v344_v19 = vadd.f32 %v343_v17, %v3144_v15  ;;  %v364_v20 = vadd.f32 %v363_v18, %v3146_v16 }
 0x307   :  { %369 = vst [vmem:[#allocation2 + $0x18] sm:$0xff] %v344_v19 }
 0x308   :  { %v2580_v21 = vpop.eup %2579  ;;  %370 = vst.msk [vmem:[#allocation2 + $0x20] sm:$0xff] %vm186_vm6, %v364_v20 }
 0x309   :  { %414 = vrot.lane.b32.xlu2 %v2580_v21, %s2861_s12 }
 0x30a   :  { %v2582_v23 = vpop.eup %2581 }
 0x30b   :  { %v395_v24 = vadd.f32 1.0, %v2582_v23 }
 0x30d   :  { %2583 = vrcp.f32 %v395_v24  ;;  %v407_v30 = vand.u32 2147483648, %v395_v24  ;;  %vm401_vm8 = vweird.f32 %v395_v24  ;;  %v405_v31 = vand.u32 2147483647, %v395_v24 }
 0x30f   :  { %v408_v33 = vor.u32 1.1754944e-38, %v407_v30  ;;  %vm406_vm10 = vcmp.eq.f32.partialorder %v405_v31, 8.507059e+37 }
 0x313   :  { %v2584_v25 = vpop.eup %2583 }
 0x314   :  { %v397_v26 = vmul.f32 %v2584_v25, %v395_v24  ;;  %vm402_vm7 = vweird.f32 %v2584_v25 }
 0x315   :  { %vm403_vm9 = vmor %vm401_vm8, %vm402_vm7 }
 0x316   :  { %v398_v27 = vsub.f32 1.0, %v397_v26 }
 0x318   :  { %v399_v28 = vmul.f32 %v2584_v25, %v398_v27 }
 0x31a   :  { %v400_v29 = vadd.f32 %v2584_v25, %v399_v28 }
 0x31c   :  { %v404_v32 = vsel %vm403_vm9, %v2584_v25, %v400_v29 }
 0x31d   :  { %v409_v48 = vsel %vm406_vm10, %v408_v33, %v404_v32 }
 0x31e   :  { %v412_v56 = vmul.f32 %v409_v48, %v2956_v34 }
 0x363   :  { %v415_v35 = vpop.permute.xlu2 %414 }
 0x364   :  { %v417_v49 = vmul.f32 %v415_v35, %v409_v48 }
 0x366   :  { %419 = vrot.lane.b32.xlu2 %v417_v49, %s2862_s13 }
 0x37e   :  { %v143_v10 = vpop.f32.mrf.mxu0 }
 0x37f   :  { %v144_v12 = vadd.f32 %v2951_v11, %v143_v10 }
 0x3c0   :  { %v420_v59 = vpop.permute.xlu2 %419 }
 0x3c1   :  { %v3154_v60 = vadd.f32 %v420_v59, %v412_v56 }
 0x3c3   :  { %2585 = vtanh.f32 %v3154_v60 }
 0x3c9   :  { %v2586_v62 = vpop.eup %2585 }
 0x3ca   :  { %425 = vrot.lane.b32.xlu0 %v2586_v62, %s2861_s12 }
 0x43c   :  { %v426_v63 = vpop.permute.xlu0 %425 }
 0x43d   :  { %v428_v0 = vmul.f32 %v426_v63, %v409_v48 }
 0x43f   :  { %430 = vrot.lane.b32.xlu1 %v428_v0, %s2862_s13 }
 0x4b1   :  { %v431_v8 = vpop.permute.xlu1 %430 }
 0x4b2   :  { %2474 = vst.msk [vmem:[%s4223_s8 + $0x8] sm:$0xff] %vm186_vm6, %v431_v8  ;;  %2475 = vmatmul.msk.f32.vlgmr.msra.gmra.mxu2 %vm186_vm6, %v431_v8  ;;  %2476 = vmatmul.msk.f32.vlgmr.msra.gmra.mxu3 %vm186_vm6, %v431_v8 }
 0x4b3   :  { %2477 = vmatmul.msk.f32.vlgmr.msrb.gmra.mxu1 %vm186_vm6, %v431_v8  ;;  %620 = vmatpush.msra.mxu2 %v2968_v37 }
 0x4b4   :  { %660 = vmatpush.msrb.mxu1 %v2963_v36  ;;  %640 = vmatpush.msra.mxu3 %v2973_v38 }
 0x4b5   :  { %621 = vmatpush.msra.mxu2 %v2985_v40 }
 0x4b6   :  { %661 = vmatpush.msrb.mxu1 %v2980_v39  ;;  %641 = vmatpush.msra.mxu3 %v2990_v41 }
 0x4b7   :  { %622 = vmatpush.msra.mxu2 %v3001_v43 }
 0x4b8   :  { %662 = vmatpush.msrb.mxu1 %v2996_v42  ;;  %642 = vmatpush.msra.mxu3 %v3009_v44 }
 0x4b9   :  { %623 = vmatpush.msra.mxu2 %v3020_v46 }
 0x4ba   :  { %2478 = vmatmul.msk.f32.vlgmr.msrb.gmra.mxu2 %vm186_vm6, %v431_v8  ;;  %2479 = vmatmul.msk.f32.vlgmr.msrb.gmra.mxu3 %vm186_vm6, %v431_v8 }
 0x4bb   :  { %2480 = vmatmul.msk.f32.vlgmr.msra.gmra.mxu1 %vm186_vm6, %v431_v8  ;;  %643 = vmatpush.msra.mxu3 %v3028_v47 }
 0x4bc   :  { %663 = vmatpush.msrb.mxu1 %v3015_v45  ;;  %680 = vmatpush.msrb.mxu2 %v3048_v50 }
 0x4bd   :  { %700 = vmatpush.msrb.mxu3 %v3053_v51 }
 0x4be   :  { %725 = vmatpush.msra.mxu1 %v2926_v2  ;;  %681 = vmatpush.msrb.mxu2 %v3058_v52 }
 0x4bf   :  { %701 = vmatpush.msrb.mxu3 %v3065_v53 }
 0x4c0   :  { %726 = vmatpush.msra.mxu1 %v2931_v3  ;;  %682 = vmatpush.msrb.mxu2 %v3070_v54 }
 0x4c1   :  { %702 = vmatpush.msrb.mxu3 %v3075_v55 }
 0x4c2   :  { %727 = vmatpush.msra.mxu1 %v2937_v5  ;;  %683 = vmatpush.msrb.mxu2 %v3086_v57 }
 0x4c3   :  { %703 = vmatpush.msrb.mxu3 %v3091_v58 }
 0x4c4   :  { %728 = vmatpush.msra.mxu1 %v2943_v7 }
 0x530   :  { %v494_v34 = vpop.f32.mrf.mxu1 }
 0x531   :  { %v495_v9 = vadd.f32 %v494_v34, %v3131_v61 }
 0x533   :  { %2421 = vst [vmem:[%s4224_s9 + $0x30] sm:$0xff] %v495_v9 }
 0x535   :  { %v454_v13 = vpop.f32.mrf.mxu2  ;;  %v474_v14 = vpop.f32.mrf.mxu3 }
 0x536   :  { %v3203_v17 = vadd.f32 %v454_v13, %v3134_v1  ;;  %v475_v18 = vadd.f32 %v474_v14, %v3136_v4 }
 0x538   :  { %537 = vst [vmem:[#allocation2 + $0x28] sm:$0xff] %v3203_v17  ;;  %v559_v19 = vpop.f32.mrf.mxu1 }
 0x539   :  { %538 = vst [vmem:[#allocation2 + $0x30] sm:$0xff] %v475_v18  ;;  %v562_v20 = vadd.f32 %v559_v19, %v144_v12  ;;  %v77_v12 = vld [vmem:[%s4215_s0 + $0x18] sm:$0xff] }
 0x53a   :  { %2461 = vmatmul.msk.f32.gmra.mxu0 %vm91_vm1, %v77_v12 }
 0x53b   :  { %2587 = vtanh.f32 %v562_v20  ;;  %v2481_v26 = vmul.f32 -1.442695, %v562_v20 }
 0x53d   :  { %v514_v21 = vpop.f32.mrf.mxu2  ;;  %v534_v22 = vpop.f32.mrf.mxu3  ;;  %2589 = vpow2.f32 %v2481_v26 }
 0x53e   :  { %v515_v23 = vadd.f32 %v514_v21, %v3144_v15  ;;  %v535_v24 = vadd.f32 %v534_v22, %v3146_v16 }
 0x540   :  { %540 = vst [vmem:[#allocation2 + $0x40] sm:$0xff] %v515_v23 }
 0x541   :  { %v2588_v25 = vpop.eup %2587  ;;  %541 = vst.msk [vmem:[#allocation2 + $0x48] sm:$0xff] %vm186_vm6, %v535_v24 }
 0x542   :  { %585 = vrot.lane.b32.xlu2 %v2588_v25, %s2861_s12 }
 0x543   :  { %v2590_v27 = vpop.eup %2589 }
 0x544   :  { %v566_v28 = vadd.f32 1.0, %v2590_v27 }
 0x546   :  { %2591 = vrcp.f32 %v566_v28  ;;  %v578_v35 = vand.u32 2147483648, %v566_v28  ;;  %vm572_vm12 = vweird.f32 %v566_v28  ;;  %v576_v48 = vand.u32 2147483647, %v566_v28 }
 0x548   :  { %v579_v56 = vor.u32 1.1754944e-38, %v578_v35  ;;  %vm577_vm14 = vcmp.eq.f32.partialorder %v576_v48, 8.507059e+37 }
 0x54c   :  { %v2592_v29 = vpop.eup %2591 }
 0x54d   :  { %v568_v30 = vmul.f32 %v2592_v29, %v566_v28  ;;  %vm573_vm11 = vweird.f32 %v2592_v29 }
 0x54e   :  { %vm574_vm13 = vmor %vm572_vm12, %vm573_vm11 }
 0x54f   :  { %v569_v31 = vsub.f32 1.0, %v568_v30 }
 0x551   :  { %v570_v32 = vmul.f32 %v2592_v29, %v569_v31 }
 0x553   :  { %v571_v33 = vadd.f32 %v2592_v29, %v570_v32 }
 0x555   :  { %v575_v49 = vsel %vm574_vm13, %v2592_v29, %v571_v33 }
 0x556   :  { %v580_v62 = vsel %vm577_vm14, %v579_v56, %v575_v49 }
 0x557   :  { %v583_v0 = vmul.f32 %v580_v62, %v3154_v60 }
 0x59c   :  { %v586_v59 = vpop.permute.xlu2 %585 }
 0x59d   :  { %v588_v63 = vmul.f32 %v586_v59, %v580_v62 }
 0x59f   :  { %590 = vrot.lane.b32.xlu0 %v588_v63, %s2862_s13 }
 0x5b7   :  { %v146_v18 = vpop.f32.mrf.mxu0 }
 0x5b8   :  { %v147_v19 = vadd.f32 %v2951_v11, %v146_v18 }
 0x611   :  { %v591_v6 = vpop.permute.xlu0 %590 }
 0x612   :  { %v3213_v8 = vadd.f32 %v591_v6, %v583_v0 }
 0x614   :  { %2593 = vtanh.f32 %v3213_v8 }
 0x61a   :  { %v2594_v34 = vpop.eup %2593 }
 0x61b   :  { %596 = vrot.lane.b32.xlu1 %v2594_v34, %s2861_s12 }
 0x68d   :  { %v597_v9 = vpop.permute.xlu1 %596 }
 0x68e   :  { %v599_v10 = vmul.f32 %v597_v9, %v580_v62 }
 0x690   :  { %601 = vrot.lane.b32.xlu2 %v599_v10, %s2862_s13 }
 0x6ea   :  { %v602_v13 = vpop.permute.xlu2 %601 }
 0x6eb   :  { %2482 = vst.msk [vmem:[%s4223_s8 + $0x10] sm:$0xff] %vm186_vm6, %v602_v13  ;;  %2483 = vmatmul.msk.f32.vlgmr.msra.gmra.mxu2 %vm186_vm6, %v602_v13  ;;  %2484 = vmatmul.msk.f32.vlgmr.msra.gmra.mxu3 %vm186_vm6, %v602_v13 }
 0x6ec   :  { %2485 = vmatmul.msk.f32.vlgmr.msrb.gmra.mxu1 %vm186_vm6, %v602_v13  ;;  %791 = vmatpush.msra.mxu2 %v2968_v37 }
 0x6ed   :  { %831 = vmatpush.msrb.mxu1 %v2963_v36  ;;  %811 = vmatpush.msra.mxu3 %v2973_v38 }
 0x6ee   :  { %792 = vmatpush.msra.mxu2 %v2985_v40 }
 0x6ef   :  { %832 = vmatpush.msrb.mxu1 %v2980_v39  ;;  %812 = vmatpush.msra.mxu3 %v2990_v41 }
 0x6f0   :  { %793 = vmatpush.msra.mxu2 %v3001_v43 }
 0x6f1   :  { %833 = vmatpush.msrb.mxu1 %v2996_v42  ;;  %813 = vmatpush.msra.mxu3 %v3009_v44 }
 0x6f2   :  { %794 = vmatpush.msra.mxu2 %v3020_v46 }
 0x6f3   :  { %2486 = vmatmul.msk.f32.vlgmr.msrb.gmra.mxu2 %vm186_vm6, %v602_v13  ;;  %2487 = vmatmul.msk.f32.vlgmr.msrb.gmra.mxu3 %vm186_vm6, %v602_v13 }
 0x6f4   :  { %2488 = vmatmul.msk.f32.vlgmr.msra.gmra.mxu1 %vm186_vm6, %v602_v13  ;;  %814 = vmatpush.msra.mxu3 %v3028_v47 }
 0x6f5   :  { %834 = vmatpush.msrb.mxu1 %v3015_v45  ;;  %851 = vmatpush.msrb.mxu2 %v3048_v50 }
 0x6f6   :  { %871 = vmatpush.msrb.mxu3 %v3053_v51 }
 0x6f7   :  { %896 = vmatpush.msra.mxu1 %v2926_v2  ;;  %852 = vmatpush.msrb.mxu2 %v3058_v52 }
 0x6f8   :  { %872 = vmatpush.msrb.mxu3 %v3065_v53 }
 0x6f9   :  { %897 = vmatpush.msra.mxu1 %v2931_v3  ;;  %853 = vmatpush.msrb.mxu2 %v3070_v54 }
 0x6fa   :  { %873 = vmatpush.msrb.mxu3 %v3075_v55 }
 0x6fb   :  { %898 = vmatpush.msra.mxu1 %v2937_v5  ;;  %854 = vmatpush.msrb.mxu2 %v3086_v57 }
 0x6fc   :  { %874 = vmatpush.msrb.mxu3 %v3091_v58 }
 0x6fd   :  { %899 = vmatpush.msra.mxu1 %v2943_v7 }
 0x769   :  { %v665_v60 = vpop.f32.mrf.mxu1 }
 0x76a   :  { %v666_v14 = vadd.f32 %v665_v60, %v3131_v61 }
 0x76c   :  { %2425 = vst [vmem:[%s4224_s9 + $0x50] sm:$0xff] %v666_v14 }
 0x76e   :  { %v625_v20 = vpop.f32.mrf.mxu2  ;;  %v645_v21 = vpop.f32.mrf.mxu3 }
 0x76f   :  { %v3262_v22 = vadd.f32 %v625_v20, %v3134_v1  ;;  %v3265_v23 = vadd.f32 %v645_v21, %v3136_v4  ;;  %v78_v20 = vld [vmem:[%s4215_s0 + $0x20] sm:$0xff] }
 0x770   :  { %2462 = vmatmul.msk.f32.gmra.mxu0 %vm91_vm1, %v78_v20 }
 0x771   :  { %708 = vst [vmem:[#allocation2 + $0x50] sm:$0xff] %v3262_v22  ;;  %v730_v24 = vpop.f32.mrf.mxu1 }
 0x772   :  { %709 = vst [vmem:[#allocation2 + $0x58] sm:$0xff] %v3265_v23  ;;  %v733_v25 = vadd.f32 %v730_v24, %v147_v19 }
 0x774   :  { %2595 = vtanh.f32 %v733_v25  ;;  %v2489_v31 = vmul.f32 -1.442695, %v733_v25 }
 0x776   :  { %v685_v26 = vpop.f32.mrf.mxu2  ;;  %v705_v27 = vpop.f32.mrf.mxu3  ;;  %2597 = vpow2.f32 %v2489_v31 }
 0x777   :  { %v686_v28 = vadd.f32 %v685_v26, %v3144_v15  ;;  %v706_v29 = vadd.f32 %v705_v27, %v3146_v16 }
 0x779   :  { %711 = vst [vmem:[#allocation2 + $0x68] sm:$0xff] %v686_v28 }
 0x77a   :  { %v2596_v30 = vpop.eup %2595  ;;  %712 = vst.msk [vmem:[#allocation2 + $0x70] sm:$0xff] %vm186_vm6, %v706_v29 }
 0x77b   :  { %756 = vrot.lane.b32.xlu0 %v2596_v30, %s2861_s12 }
 0x77c   :  { %v2598_v32 = vpop.eup %2597 }
 0x77d   :  { %v737_v33 = vadd.f32 1.0, %v2598_v32 }
 0x77f   :  { %2599 = vrcp.f32 %v737_v33  ;;  %v749_v62 = vand.u32 2147483648, %v737_v33  ;;  %vm743_vm0 = vweird.f32 %v737_v33  ;;  %v747_v63 = vand.u32 2147483647, %v737_v33 }
 0x781   :  { %v750_v6 = vor.u32 1.1754944e-38, %v749_v62  ;;  %vm748_vm3 = vcmp.eq.f32.partialorder %v747_v63, 8.507059e+37 }
 0x785   :  { %v2600_v35 = vpop.eup %2599 }
 0x786   :  { %v739_v48 = vmul.f32 %v2600_v35, %v737_v33  ;;  %vm744_vm15 = vweird.f32 %v2600_v35 }
 0x787   :  { %vm745_vm2 = vmor %vm743_vm0, %vm744_vm15 }
 0x788   :  { %v740_v49 = vsub.f32 1.0, %v739_v48 }
 0x78a   :  { %v741_v56 = vmul.f32 %v2600_v35, %v740_v49 }
 0x78c   :  { %v742_v59 = vadd.f32 %v2600_v35, %v741_v56 }
 0x78e   :  { %v746_v0 = vsel %vm745_vm2, %v2600_v35, %v742_v59 }
 0x78f   :  { %v751_v9 = vsel %vm748_vm3, %v750_v6, %v746_v0 }
 0x790   :  { %v754_v12 = vmul.f32 %v751_v9, %v3213_v8 }
 0x7ed   :  { %v757_v34 = vpop.permute.xlu0 %756  ;;  %v149_v25 = vpop.f32.mrf.mxu0 }
 0x7ee   :  { %v759_v10 = vmul.f32 %v757_v34, %v751_v9  ;;  %v150_v26 = vadd.f32 %v2951_v11, %v149_v25 }
 0x7f0   :  { %761 = vrot.lane.b32.xlu1 %v759_v10, %s2862_s13 }
 0x862   :  { %v762_v13 = vpop.permute.xlu1 %761 }
 0x863   :  { %v3275_v60 = vadd.f32 %v762_v13, %v754_v12 }
 0x865   :  { %2601 = vtanh.f32 %v3275_v60 }
 0x86b   :  { %v2602_v14 = vpop.eup %2601 }
 0x86c   :  { %767 = vrot.lane.b32.xlu2 %v2602_v14, %s2861_s12 }
 0x8c6   :  { %v768_v18 = vpop.permute.xlu2 %767 }
 0x8c7   :  { %v770_v19 = vmul.f32 %v768_v18, %v751_v9 }
 0x8c9   :  { %772 = vrot.lane.b32.xlu0 %v770_v19, %s2862_s13 }
 0x93b   :  { %v773_v21 = vpop.permute.xlu0 %772 }
 0x93c   :  { %2490 = vst.msk [vmem:[%s4223_s8 + $0x18] sm:$0xff] %vm186_vm6, %v773_v21  ;;  %2491 = vmatmul.msk.f32.vlgmr.msra.gmra.mxu2 %vm186_vm6, %v773_v21  ;;  %2492 = vmatmul.msk.f32.vlgmr.msra.gmra.mxu3 %vm186_vm6, %v773_v21 }
 0x93d   :  { %2493 = vmatmul.msk.f32.vlgmr.msrb.gmra.mxu1 %vm186_vm6, %v773_v21  ;;  %982 = vmatpush.msra.mxu3 %v2973_v38 }
 0x93e   :  { %962 = vmatpush.msra.mxu2 %v2968_v37  ;;  %1022 = vmatpush.msrb.mxu1 %v3048_v50 }
 0x93f   :  { %983 = vmatpush.msra.mxu3 %v2990_v41 }
 0x940   :  { %963 = vmatpush.msra.mxu2 %v2985_v40  ;;  %1023 = vmatpush.msrb.mxu1 %v3058_v52 }
 0x941   :  { %984 = vmatpush.msra.mxu3 %v3009_v44 }
 0x942   :  { %964 = vmatpush.msra.mxu2 %v3001_v43  ;;  %1024 = vmatpush.msrb.mxu1 %v3070_v54 }
 0x943   :  { %985 = vmatpush.msra.mxu3 %v3028_v47 }
 0x944   :  { %2494 = vmatmul.msk.f32.vlgmr.msrb.gmra.mxu2 %vm186_vm6, %v773_v21  ;;  %2495 = vmatmul.msk.f32.vlgmr.msrb.gmra.mxu3 %vm186_vm6, %v773_v21 }
 0x945   :  { %2496 = vmatmul.msk.f32.vlgmr.msra.gmra.mxu1 %vm186_vm6, %v773_v21  ;;  %965 = vmatpush.msra.mxu2 %v3020_v46 }
 0x946   :  { %1025 = vmatpush.msrb.mxu1 %v3086_v57  ;;  %1067 = vmatpush.msrb.mxu3 %v2926_v2 }
 0x947   :  { %1042 = vmatpush.msrb.mxu2 %v3053_v51 }
 0x948   :  { %1153 = vmatpush.msra.mxu1 %v2973_v38  ;;  %1068 = vmatpush.msrb.mxu3 %v2931_v3 }
 0x949   :  { %1043 = vmatpush.msrb.mxu2 %v3065_v53 }
 0x94a   :  { %1154 = vmatpush.msra.mxu1 %v2990_v41  ;;  %1069 = vmatpush.msrb.mxu3 %v2937_v5 }
 0x94b   :  { %1044 = vmatpush.msrb.mxu2 %v3075_v55 }
 0x94c   :  { %1155 = vmatpush.msra.mxu1 %v3009_v44  ;;  %1070 = vmatpush.msrb.mxu3 %v2943_v7 }
 0x94d   :  { %1045 = vmatpush.msrb.mxu2 %v3091_v58 }
 0x94e   :  { %1156 = vmatpush.msra.mxu1 %v3028_v47 }
 0x9ba   :  { %v836_v8 = vpop.f32.mrf.mxu1 }
 0x9bb   :  { %v837_v24 = vadd.f32 %v836_v8, %v3131_v61 }
 0x9bd   :  { %2429 = vst [vmem:[%s4224_s9 + $0x70] sm:$0xff] %v837_v24 }
 0x9bf   :  { %v796_v27 = vpop.f32.mrf.mxu2  ;;  %v816_v28 = vpop.f32.mrf.mxu3 }
 0x9c0   :  { %v3324_v29 = vadd.f32 %v796_v27, %v3134_v1  ;;  %v3327_v30 = vadd.f32 %v816_v28, %v3136_v4  ;;  %v79_v27 = vld [vmem:[%s4215_s0 + $0x28] sm:$0xff]  ;;  %v80_v28 = vld [vmem:[%s4215_s0 + $0x30] sm:$0xff] }
 0x9c1   :  { %2463 = vmatmul.msk.f32.gmra.mxu0 %vm91_vm1, %v79_v27 }
 0x9c2   :  { %879 = vst [vmem:[#allocation2 + $0x78] sm:$0xff] %v3324_v29  ;;  %v901_v31 = vpop.f32.mrf.mxu1 }
 0x9c3   :  { %880 = vst [vmem:[#allocation2 + $0x80] sm:$0xff] %v3327_v30  ;;  %v904_v32 = vadd.f32 %v901_v31, %v150_v26 }
 0x9c5   :  { %2603 = vtanh.f32 %v904_v32  ;;  %v2497_v59 = vmul.f32 -1.442695, %v904_v32 }
 0x9c7   :  { %v856_v33 = vpop.f32.mrf.mxu2  ;;  %v876_v35 = vpop.f32.mrf.mxu3  ;;  %2605 = vpow2.f32 %v2497_v59 }
 0x9c8   :  { %v3332_v48 = vadd.f32 %v856_v33, %v3144_v15  ;;  %v877_v49 = vadd.f32 %v876_v35, %v3146_v16 }
 0x9c9   :  { %2464 = vmatmul.msk.f32.gmra.mxu0 %vm91_vm1, %v80_v28  ;;  %v2732_v28 = vld [vmem:[%s4217_s2 + $0x18] sm:$0xff] }
 0x9ca   :  { %882 = vst [vmem:[#allocation2 + $0x90] sm:$0xff] %v3332_v48 }
 0x9cb   :  { %v2604_v56 = vpop.eup %2603  ;;  %883 = vst.msk [vmem:[#allocation2 + $0x98] sm:$0xff] %vm186_vm6, %v877_v49 }
 0x9cc   :  { %927 = vrot.lane.b32.xlu1 %v2604_v56, %s2861_s12 }
 0x9cd   :  { %v2606_v62 = vpop.eup %2605 }
 0x9ce   :  { %v908_v63 = vadd.f32 1.0, %v2606_v62 }
 0x9d0   :  { %2607 = vrcp.f32 %v908_v63  ;;  %v920_v12 = vand.u32 2147483648, %v908_v63  ;;  %vm914_vm5 = vweird.f32 %v908_v63  ;;  %v918_v13 = vand.u32 2147483647, %v908_v63 }
 0x9d2   :  { %v921_v18 = vor.u32 1.1754944e-38, %v920_v12  ;;  %vm919_vm8 = vcmp.eq.f32.partialorder %v918_v13, 8.507059e+37 }
 0x9d6   :  { %v2608_v0 = vpop.eup %2607 }
 0x9d7   :  { %v910_v6 = vmul.f32 %v2608_v0, %v908_v63  ;;  %vm915_vm4 = vweird.f32 %v2608_v0 }
 0x9d8   :  { %vm916_vm7 = vmor %vm914_vm5, %vm915_vm4  ;;  %vm2208_vm5 = vcmask 523264  }
 0x9d9   :  { %v911_v34 = vsub.f32 1.0, %v910_v6 }
 0x9db   :  { %v912_v9 = vmul.f32 %v2608_v0, %v911_v34 }
 0x9dd   :  { %v913_v10 = vadd.f32 %v2608_v0, %v912_v9 }
 0x9df   :  { %v917_v14 = vsel %vm916_vm7, %v2608_v0, %v913_v10  ;;  %vm2217_vm7 = vcmask 785408  }
 0x9e0   :  { %v922_v20 = vsel %vm919_vm8, %v921_v18, %v917_v14 }
 0x9e1   :  { %v925_v8 = vmul.f32 %v922_v20, %v3275_v60  ;;  %v81_v60 = vld [vmem:[%s4215_s0 + $0x38] sm:$0xff] }
 0x9e2   :  { %2465 = vmatmul.msk.f32.gmra.mxu0 %vm91_vm1, %v81_v60  ;;  %v3444_v60 = vld [vmem:[%s4219_s4 + $0x60] sm:$0xff] }
 0xa3e   :  { %v928_v19 = vpop.permute.xlu1 %927 }
 0xa3f   :  { %v930_v21 = vmul.f32 %v928_v19, %v922_v20 }
 0xa41   :  { %932 = vrot.lane.b32.xlu2 %v930_v21, %s2862_s13 }
 0xa9b   :  { %v933_v24 = vpop.permute.xlu2 %932 }
 0xa9c   :  { %v3340_v25 = vadd.f32 %v933_v24, %v925_v8 }
 0xa9e   :  { %2609 = vtanh.f32 %v3340_v25 }
 0xaa4   :  { %v2610_v26 = vpop.eup %2609 }
 0xaa5   :  { %938 = vrot.lane.b32.xlu0 %v2610_v26, %s2861_s12 }
 0xb17   :  { %v939_v31 = vpop.permute.xlu0 %938 }
 0xb18   :  { %v941_v32 = vmul.f32 %v939_v31, %v922_v20  ;;  %v2741_v31 = vld [vmem:[%s4219_s4 + $0x50] sm:$0xff] }
 0xb1a   :  { %943 = vrot.lane.b32.xlu1 %v941_v32, %s2862_s13  ;;  %v2742_v32 = vld [vmem:[%s4219_s4 + $0x58] sm:$0xff] }
 0xb8c   :  { %v944_v33 = vpop.permute.xlu1 %943 }
 0xb8d   :  { %2498 = vst.msk [vmem:[%s4223_s8 + $0x20] sm:$0xff] %vm186_vm6, %v944_v33  ;;  %2499 = vmatmul.msk.f32.vlgmr.msra.gmra.mxu2 %vm186_vm6, %v944_v33  ;;  %2500 = vmatmul.msk.f32.vlgmr.msra.gmra.mxu3 %vm186_vm6, %v944_v33 }
 0xb8e   :  { %2501 = vmatmul.msk.f32.vlgmr.msrb.gmra.mxu0 %vm186_vm6, %v944_v33  ;;  %2502 = vmatmul.msk.f32.vlgmr.msrb.gmra.mxu1 %vm186_vm6, %v944_v33 }
 0xb8f   :  { %1173 = vmatpush.msra.mxu2 %v2963_v36  ;;  %1193 = vmatpush.msra.mxu3 %v3048_v50 }
 0xb90   :  { %1238 = vmatpush.msrb.mxu1 %v2926_v2  ;;  %1213 = vmatpush.msrb.mxu0 %v3053_v51  ;;  %v152_v2 = vpop.f32.mrf.mxu0 }
 0xb91   :  { %1174 = vmatpush.msra.mxu2 %v2980_v39  ;;  %1194 = vmatpush.msra.mxu3 %v3058_v52 }
 0xb92   :  { %1239 = vmatpush.msrb.mxu1 %v2931_v3  ;;  %1214 = vmatpush.msrb.mxu0 %v3065_v53 }
 0xb93   :  { %1175 = vmatpush.msra.mxu2 %v2996_v42  ;;  %1195 = vmatpush.msra.mxu3 %v3070_v54 }
 0xb94   :  { %1240 = vmatpush.msrb.mxu1 %v2937_v5  ;;  %1215 = vmatpush.msrb.mxu0 %v3075_v55 }
 0xb95   :  { %2503 = vmatmul.msk.f32.vlgmr.msrb.gmra.mxu2 %vm186_vm6, %v944_v33  ;;  %2504 = vmatmul.msk.f32.vlgmr.msrb.gmra.mxu3 %vm186_vm6, %v944_v33  ;;  %v2744_v33 = vld [vmem:[%s4219_s4 + $0x30] sm:$0xff] }
 0xb96   :  { %1196 = vmatpush.msra.mxu3 %v3086_v57  ;;  %1176 = vmatpush.msra.mxu2 %v3015_v45 }
 0xb97   :  { %1241 = vmatpush.msrb.mxu1 %v2943_v7  ;;  %1216 = vmatpush.msrb.mxu0 %v3091_v58 }
 0xb98   :  { %1324 = vmatpush.msrb.mxu3 %v2973_v38  ;;  %1304 = vmatpush.msrb.mxu2 %v2968_v37  ;;  %v3391_v3 = vpop.f32.mrf.mxu0 }
 0xb9a   :  { %1325 = vmatpush.msrb.mxu3 %v2990_v41  ;;  %1305 = vmatpush.msrb.mxu2 %v2985_v40 }
 0xb9c   :  { %1326 = vmatpush.msrb.mxu3 %v3009_v44  ;;  %1306 = vmatpush.msrb.mxu2 %v3001_v43  ;;  %v153_v43 = vadd.f32 %v2951_v11, %v152_v2  ;;  %v2745_v2 = vld [vmem:[%s4219_s4 + $0x8] sm:$0xff] }
 0xb9e   :  { %1327 = vmatpush.msrb.mxu3 %v3028_v47  ;;  %1307 = vmatpush.msrb.mxu2 %v3020_v46 }
 0xba0   :  { %v3393_v5 = vpop.f32.mrf.mxu0 }
 0xc0b   :  { %v1007_v7 = vpop.f32.mrf.mxu0  ;;  %v1027_v36 = vpop.f32.mrf.mxu1 }
 0xc0c   :  { %v1008_v37 = vadd.f32 %v1007_v7, %v3131_v61  ;;  %v3397_v38 = vadd.f32 %v1027_v36, %v3144_v15  ;;  %v2746_v7 = vld [vmem:[%s4219_s4] sm:$0xff] }
 0xc0e   :  { %2433 = vst [vmem:[%s4224_s9 + $0x90] sm:$0xff] %v1008_v37 }
 0xc0f   :  { %1053 = vst [vmem:[#allocation2 + $0xb8] sm:$0xff] %v3397_v38 }
 0xc10   :  { %v967_v39 = vpop.f32.mrf.mxu2  ;;  %v987_v40 = vpop.f32.mrf.mxu3 }
 0xc11   :  { %v3404_v41 = vadd.f32 %v967_v39, %v3134_v1  ;;  %v3407_v42 = vadd.f32 %v987_v40, %v3136_v4 }
 0xc13   :  { %1050 = vst [vmem:[#allocation2 + $0xa0] sm:$0xff] %v3404_v41 }
 0xc14   :  { %1051 = vst [vmem:[#allocation2 + $0xa8] sm:$0xff] %v3407_v42 }
 0xc18   :  { %v1047_v44 = vpop.f32.mrf.mxu2  ;;  %v1072_v45 = vpop.f32.mrf.mxu3 }
 0xc19   :  { %v1048_v46 = vadd.f32 %v1047_v44, %v3146_v16  ;;  %v1075_v47 = vadd.f32 %v1072_v45, %v153_v43  ;;  %v3508_v43 = vld [vmem:[#allocation5] ss:$0 sm:$0xff] }
 0xc1a   :  { %v156_v44 = vadd.f32 %v3508_v43, %v3391_v3 }
 0xc1b   :  { %1054 = vst.msk [vmem:[#allocation2 + $0xc0] sm:$0xff] %vm186_vm6, %v1048_v46  ;;  %2611 = vtanh.f32 %v1075_v47  ;;  %v2505_v49 = vmul.f32 -1.442695, %v1075_v47 }
 0xc1d   :  { %2613 = vpow2.f32 %v2505_v49 }
 0xc21   :  { %v2612_v35 = vpop.eup %2611 }
 0xc22   :  { %1098 = vrot.lane.b32.xlu2 %v2612_v35, %s2861_s12 }
 0xc23   :  { %v2614_v56 = vpop.eup %2613 }
 0xc24   :  { %v1079_v59 = vadd.f32 1.0, %v2614_v56 }
 0xc26   :  { %2615 = vrcp.f32 %v1079_v59  ;;  %v1091_v34 = vand.u32 2147483648, %v1079_v59  ;;  %vm1085_vm9 = vweird.f32 %v1079_v59  ;;  %v1089_v9 = vand.u32 2147483647, %v1079_v59 }
 0xc28   :  { %v1092_v12 = vor.u32 1.1754944e-38, %v1091_v34  ;;  %vm1090_vm11 = vcmp.eq.f32.partialorder %v1089_v9, 8.507059e+37 }
 0xc2c   :  { %v2616_v62 = vpop.eup %2615 }
 0xc2d   :  { %v1081_v63 = vmul.f32 %v2616_v62, %v1079_v59  ;;  %vm1086_vm1 = vweird.f32 %v2616_v62 }
 0xc2e   :  { %vm1087_vm10 = vmor %vm1085_vm9, %vm1086_vm1 }
 0xc2f   :  { %v1082_v0 = vsub.f32 1.0, %v1081_v63 }
 0xc31   :  { %v1083_v11 = vmul.f32 %v2616_v62, %v1082_v0 }
 0xc33   :  { %v1084_v6 = vadd.f32 %v2616_v62, %v1083_v11 }
 0xc35   :  { %v1088_v10 = vsel %vm1087_vm10, %v2616_v62, %v1084_v6 }
 0xc36   :  { %v1093_v14 = vsel %vm1090_vm11, %v1092_v12, %v1088_v10 }
 0xc37   :  { %v1096_v19 = vmul.f32 %v1093_v14, %v3340_v25  ;;  %v3433_v25 = vld [vmem:[%s4219_s4 + $0x88] sm:$0xff] }
 0xc7c   :  { %v1099_v13 = vpop.permute.xlu2 %1098 }
 0xc7d   :  { %v1101_v18 = vmul.f32 %v1099_v13, %v1093_v14 }
 0xc7f   :  { %1103 = vrot.lane.b32.xlu0 %v1101_v18, %s2862_s13 }
 0xcf1   :  { %v1104_v20 = vpop.permute.xlu0 %1103 }
 0xcf2   :  { %v3417_v21 = vadd.f32 %v1104_v20, %v1096_v19 }
 0xcf4   :  { %2617 = vtanh.f32 %v3417_v21 }
 0xcfa   :  { %v2618_v8 = vpop.eup %2617 }
 0xcfb   :  { %1109 = vrot.lane.b32.xlu1 %v2618_v8, %s2861_s12 }
 0xd6d   :  { %v1110_v24 = vpop.permute.xlu1 %1109 }
 0xd6e   :  { %v1112_v26 = vmul.f32 %v1110_v24, %v1093_v14 }
 0xd70   :  { %1114 = vrot.lane.b32.xlu2 %v1112_v26, %s2862_s13 }
 0xdca   :  { %v1115_v27 = vpop.permute.xlu2 %1114 }
 0xdcb   :  { %2506 = vst.msk [vmem:[%s4223_s8 + $0x28] sm:$0xff] %vm186_vm6, %v1115_v27  ;;  %2507 = vmatmul.msk.f32.vlgmr.msra.gmra.mxu0 %vm186_vm6, %v1115_v27  ;;  %2508 = vmatmul.msk.f32.vlgmr.msra.gmra.mxu1 %vm186_vm6, %v1115_v27 }
 0xdcc   :  { %2509 = vmatmul.msk.f32.vlgmr.msra.gmra.mxu2 %vm186_vm6, %v1115_v27  ;;  %2510 = vmatmul.msk.f32.vlgmr.msra.gmra.mxu3 %vm186_vm6, %v1115_v27 }
 0xdcd   :  { %1344 = vmatpush.msra.mxu0 %v3433_v25  ;;  %1364 = vmatpush.msra.mxu1 %v3048_v50  ;;  %v2734_v50 = vld [vmem:[%s4217_s2 + $0x10] sm:$0xff] }
 0xdce   :  { %1409 = vmatpush.msra.mxu3 %v2732_v28  ;;  %1384 = vmatpush.msra.mxu2 %v3053_v51  ;;  %v3455_v51 = vld [vmem:[%s4219_s4 + $0x38] sm:$0xff] }
 0xdcf   :  { %1345 = vmatpush.msra.mxu0 %v3444_v60  ;;  %1365 = vmatpush.msra.mxu1 %v3058_v52  ;;  %v2736_v52 = vld [vmem:[%s4217_s2 + $0x8] sm:$0xff] }
 0xdd0   :  { %1410 = vmatpush.msra.mxu3 %v2734_v50  ;;  %1385 = vmatpush.msra.mxu2 %v3065_v53  ;;  %v3469_v53 = vld [vmem:[%s4219_s4 + $0x10] sm:$0xff] }
 0xdd1   :  { %1346 = vmatpush.msra.mxu0 %v3455_v51  ;;  %1366 = vmatpush.msra.mxu1 %v3070_v54  ;;  %v2738_v54 = vld [vmem:[%s4217_s2] sm:$0xff] }
 0xdd2   :  { %1411 = vmatpush.msra.mxu3 %v2736_v52  ;;  %1386 = vmatpush.msra.mxu2 %v3075_v55  ;;  %v2739_v55 = vld [vmem:[%s4219_s4 + $0x78] sm:$0xff] }
 0xdd3   :  { %2511 = vmatmul.msk.f32.vlgmr.msrb.gmra.mxu0 %vm186_vm6, %v1115_v27  ;;  %2512 = vmatmul.msk.f32.vlgmr.msrb.gmra.mxu1 %vm186_vm6, %v1115_v27 }
 0xdd4   :  { %1367 = vmatpush.msra.mxu1 %v3086_v57  ;;  %1347 = vmatpush.msra.mxu0 %v3469_v53  ;;  %v2740_v57 = vld [vmem:[%s4219_s4 + $0x80] sm:$0xff] }
 0xdd5   :  { %1412 = vmatpush.msra.mxu3 %v2738_v54  ;;  %1387 = vmatpush.msra.mxu2 %v3091_v58  ;;  %v2743_v58 = vld [vmem:[%s4219_s4 + $0x28] sm:$0xff] }
 0xdd6   :  { %1475 = vmatpush.msrb.mxu0 %v2739_v55  ;;  %1495 = vmatpush.msrb.mxu1 %v2740_v57  ;;  %v2749_v57 = vld [vmem:[%s4219_s4 + $0x98] sm:$0xff] }
 0xdd8   :  { %1476 = vmatpush.msrb.mxu0 %v2741_v31  ;;  %1496 = vmatpush.msrb.mxu1 %v2742_v32  ;;  %v2750_v31 = vld [vmem:[%s4219_s4 + $0x68] sm:$0xff]  ;;  %v2752_v32 = vld [vmem:[%s4219_s4 + $0x40] sm:$0xff] }
 0xdda   :  { %1477 = vmatpush.msrb.mxu0 %v2743_v58  ;;  %1497 = vmatpush.msrb.mxu1 %v2744_v33  ;;  %v2754_v58 = vld [vmem:[%s4219_s4 + $0x18] sm:$0xff] }
 0xddc   :  { %1498 = vmatpush.msrb.mxu1 %v2745_v2  ;;  %1478 = vmatpush.msrb.mxu0 %v2746_v7 }
 0xe48   :  { %v1138_v36 = vpop.f32.mrf.mxu0  ;;  %v1158_v37 = vpop.f32.mrf.mxu1 }
 0xe49   :  { %v3501_v39 = vadd.f32 %v1138_v36, %v3134_v1  ;;  %v3504_v40 = vadd.f32 %v1158_v37, %v3136_v4 }
 0xe4b   :  { %1221 = vst [vmem:[#allocation2 + $0xc8] sm:$0xff] %v3501_v39 }
 0xe4c   :  { %1222 = vst [vmem:[#allocation2 + $0xd0] sm:$0xff] %v3504_v40 }
 0xe4f   :  { %v1178_v45 = vpop.f32.mrf.mxu2  ;;  %v1198_v46 = vpop.f32.mrf.mxu3 }
 0xe50   :  { %v1179_v47 = vadd.f32 %v1178_v45, %v3131_v61  ;;  %v3514_v35 = vadd.f32 %v1198_v46, %v3144_v15  ;;  %v1218_v49 = vpop.f32.mrf.mxu0  ;;  %v1243_v56 = vpop.f32.mrf.mxu1  ;;  %v159_v46 = vadd.f32 %v3508_v43, %v3393_v5 }
 0xe51   :  { %v1219_v59 = vadd.f32 %v1218_v49, %v3146_v16  ;;  %v1246_v62 = vadd.f32 %v1243_v56, %v156_v44 }
 0xe52   :  { %2437 = vst [vmem:[%s4224_s9 + $0xb0] sm:$0xff] %v1179_v47 }
 0xe53   :  { %2619 = vtanh.f32 %v1246_v62  ;;  %1224 = vst [vmem:[#allocation2 + $0xe0] sm:$0xff] %v3514_v35  ;;  %v2513_v63 = vmul.f32 -1.442695, %v1246_v62 }
 0xe54   :  { %1225 = vst.msk [vmem:[#allocation2 + $0xe8] sm:$0xff] %vm186_vm6, %v1219_v59 }
 0xe55   :  { %2621 = vpow2.f32 %v2513_v63 }
 0xe59   :  { %v2620_v3 = vpop.eup %2619 }
 0xe5a   :  { %1269 = vrot.lane.b32.xlu0 %v2620_v3, %s2861_s12 }
 0xe5b   :  { %v2622_v0 = vpop.eup %2621 }
 0xe5c   :  { %v1250_v11 = vadd.f32 1.0, %v2622_v0 }
 0xe5e   :  { %2623 = vrcp.f32 %v1250_v11  ;;  %v1262_v13 = vand.u32 2147483648, %v1250_v11  ;;  %vm1256_vm13 = vweird.f32 %v1250_v11  ;;  %v1260_v14 = vand.u32 2147483647, %v1250_v11 }
 0xe60   :  { %v1263_v19 = vor.u32 1.1754944e-38, %v1262_v13  ;;  %vm1261_vm15 = vcmp.eq.f32.partialorder %v1260_v14, 8.507059e+37 }
 0xe64   :  { %v2624_v6 = vpop.eup %2623 }
 0xe65   :  { %v1252_v34 = vmul.f32 %v2624_v6, %v1250_v11  ;;  %vm1257_vm12 = vweird.f32 %v2624_v6 }
 0xe66   :  { %vm1258_vm14 = vmor %vm1256_vm13, %vm1257_vm12 }
 0xe67   :  { %v1253_v9 = vsub.f32 1.0, %v1252_v34 }
 0xe69   :  { %v1254_v10 = vmul.f32 %v2624_v6, %v1253_v9 }
 0xe6b   :  { %v1255_v12 = vadd.f32 %v2624_v6, %v1254_v10 }
 0xe6d   :  { %v1259_v18 = vsel %vm1258_vm14, %v2624_v6, %v1255_v12 }
 0xe6e   :  { %v1264_v8 = vsel %vm1261_vm15, %v1263_v19, %v1259_v18 }
 0xe6f   :  { %v1267_v26 = vmul.f32 %v1264_v8, %v3417_v21  ;;  %v2748_v21 = vld [vmem:[%s4219_s4 + $0x90] sm:$0xff] }
 0xecc   :  { %v1270_v20 = vpop.permute.xlu0 %1269 }
 0xecd   :  { %v1272_v24 = vmul.f32 %v1270_v20, %v1264_v8  ;;  %v3590_v20 = vld [vmem:[#allocation2] sm:$0xff] }
 0xecf   :  { %1274 = vrot.lane.b32.xlu1 %v1272_v24, %s2862_s13 }
 0xf41   :  { %v1275_v27 = vpop.permute.xlu1 %1274 }
 0xf42   :  { %v3525_v28 = vadd.f32 %v1275_v27, %v1267_v26 }
 0xf44   :  { %2625 = vtanh.f32 %v3525_v28 }
 0xf4a   :  { %v2626_v50 = vpop.eup %2625 }
 0xf4b   :  { %1280 = vrot.lane.b32.xlu2 %v2626_v50, %s2861_s12 }
 0xfa5   :  { %v1281_v52 = vpop.permute.xlu2 %1280 }
 0xfa6   :  { %v1283_v54 = vmul.f32 %v1281_v52, %v1264_v8 }
 0xfa8   :  { %1285 = vrot.lane.b32.xlu0 %v1283_v54, %s2862_s13 }
0x101a   :  { %v1286_v55 = vpop.permute.xlu0 %1285 }
0x101b   :  { %2514 = vst.msk [vmem:[%s4223_s8 + $0x30] sm:$0xff] %vm186_vm6, %v1286_v55  ;;  %2515 = vmatmul.msk.f32.vlgmr.msrb.gmra.mxu2 %vm186_vm6, %v1286_v55  ;;  %2516 = vmatmul.msk.f32.vlgmr.msrb.gmra.mxu3 %vm186_vm6, %v1286_v55 }
0x101c   :  { %2517 = vmatmul.msk.f32.vlgmr.msra.gmra.mxu0 %vm186_vm6, %v1286_v55  ;;  %2518 = vmatmul.msk.f32.vlgmr.msra.gmra.mxu1 %vm186_vm6, %v1286_v55 }
0x101d   :  { %1515 = vmatpush.msrb.mxu2 %v3433_v25  ;;  %1535 = vmatpush.msrb.mxu3 %v2748_v21  ;;  %v2751_v25 = vld [vmem:[%s4219_s4 + $0x70] sm:$0xff] }
0x101e   :  { %1555 = vmatpush.msra.mxu0 %v2749_v57 }
0x101f   :  { %1516 = vmatpush.msrb.mxu2 %v3444_v60  ;;  %1536 = vmatpush.msrb.mxu3 %v2750_v31  ;;  %v2753_v60 = vld [vmem:[%s4219_s4 + $0x48] sm:$0xff] }
0x1020   :  { %1556 = vmatpush.msra.mxu0 %v2751_v25 }
0x1021   :  { %1517 = vmatpush.msrb.mxu2 %v3455_v51  ;;  %1537 = vmatpush.msrb.mxu3 %v2752_v32  ;;  %v2755_v51 = vld [vmem:[%s4219_s4 + $0x20] sm:$0xff]  ;;  %s2863_s4 = smov 96  }
0x1022   :  { %1557 = vmatpush.msra.mxu0 %v2753_v60 }
0x1023   :  { %2519 = vmatmul.msk.f32.vlgmr.msra.gmra.mxu2 %vm186_vm6, %v1286_v55  ;;  %2520 = vmatmul.msk.f32.vlgmr.msra.gmra.mxu3 %vm186_vm6, %v1286_v55 }
0x1024   :  { %1538 = vmatpush.msrb.mxu3 %v2754_v58  ;;  %1518 = vmatpush.msrb.mxu2 %v3469_v53 }
0x1025   :  { %1558 = vmatpush.msra.mxu0 %v2755_v51 }
0x1099   :  { %v1349_v33 = vpop.f32.mrf.mxu0  ;;  %v1369_v2 = vpop.f32.mrf.mxu1 }
0x109a   :  { %v1350_v7 = vadd.f32 %v1349_v33, %v3131_v61  ;;  %v3570_v36 = vadd.f32 %v1369_v2, %v3144_v15 }
0x109c   :  { %2441 = vst [vmem:[%s4224_s9 + $0xd0] sm:$0xff] %v1350_v7 }
0x109d   :  { %1395 = vst [vmem:[#allocation2 + $0x108] sm:$0xff] %v3570_v36 }
0x109e   :  { %v1309_v37 = vpop.f32.mrf.mxu2  ;;  %v1329_v53 = vpop.f32.mrf.mxu3 }
0x109f   :  { %v3577_v44 = vadd.f32 %v1309_v37, %v3134_v1  ;;  %v3580_v45 = vadd.f32 %v1329_v53, %v3136_v4 }
0x10a1   :  { %1392 = vst [vmem:[#allocation2 + $0xf0] sm:$0xff] %v3577_v44 }
0x10a2   :  { %1393 = vst [vmem:[#allocation2 + $0xf8] sm:$0xff] %v3580_v45 }
0x10a6   :  { %v1389_v47 = vpop.f32.mrf.mxu2  ;;  %v1414_v49 = vpop.f32.mrf.mxu3 }
0x10a7   :  { %v1390_v56 = vadd.f32 %v1389_v47, %v3146_v16  ;;  %v1417_v59 = vadd.f32 %v1414_v49, %v159_v46 }
0x10a9   :  { %1396 = vst.msk [vmem:[#allocation2 + $0x110] sm:$0xff] %vm186_vm6, %v1390_v56  ;;  %2627 = vtanh.f32 %v1417_v59  ;;  %v2521_v3 = vmul.f32 -1.442695, %v1417_v59 }
0x10ab   :  { %2629 = vpow2.f32 %v2521_v3 }
0x10af   :  { %v2628_v62 = vpop.eup %2627 }
0x10b0   :  { %1440 = vrot.lane.b32.xlu1 %v2628_v62, %s2861_s12 }
0x10b1   :  { %v2630_v63 = vpop.eup %2629 }
0x10b2   :  { %v1421_v0 = vadd.f32 1.0, %v2630_v63 }
0x10b4   :  { %2631 = vrcp.f32 %v1421_v0  ;;  %v1433_v9 = vand.u32 2147483648, %v1421_v0  ;;  %vm1427_vm2 = vweird.f32 %v1421_v0  ;;  %v1431_v10 = vand.u32 2147483647, %v1421_v0 }
0x10b6   :  { %v1434_v13 = vor.u32 1.1754944e-38, %v1433_v9  ;;  %vm1432_vm4 = vcmp.eq.f32.partialorder %v1431_v10, 8.507059e+37 }
0x10ba   :  { %v2632_v11 = vpop.eup %2631 }
0x10bb   :  { %v1423_v6 = vmul.f32 %v2632_v11, %v1421_v0  ;;  %vm1428_vm0 = vweird.f32 %v2632_v11 }
0x10bc   :  { %vm1429_vm3 = vmor %vm1427_vm2, %vm1428_vm0 }
0x10bd   :  { %v1424_v34 = vsub.f32 1.0, %v1423_v6 }
0x10bf   :  { %v1425_v5 = vmul.f32 %v2632_v11, %v1424_v34 }
0x10c1   :  { %v1426_v43 = vadd.f32 %v2632_v11, %v1425_v5 }
0x10c3   :  { %v1430_v12 = vsel %vm1429_vm3, %v2632_v11, %v1426_v43  ;;  %v3659_v11 = vld [vmem:[#allocation2 + $0x8] sm:$0xff] }
0x10c4   :  { %v1435_v18 = vsel %vm1432_vm4, %v1434_v13, %v1430_v12 }
0x10c5   :  { %v1438_v8 = vmul.f32 %v1435_v18, %v3525_v28 }
0x1122   :  { %v1441_v14 = vpop.permute.xlu1 %1440 }
0x1123   :  { %v1443_v19 = vmul.f32 %v1441_v14, %v1435_v18 }
0x1125   :  { %1445 = vrot.lane.b32.xlu2 %v1443_v19, %s2862_s13  ;;  %v3673_v19 = vld [vmem:[#allocation2 + $0x28] sm:$0xff] }
0x112d   :  { %1616 = vrot.lane.b32.xlu2 %v3590_v20, %s2863_s4 }
0x1135   :  { %1622 = vrot.lane.b32.xlu2 %v3324_v29, %s2863_s4 }
0x113d   :  { %1628 = vrot.lane.b32.xlu2 %v3577_v44, %s2863_s4 }
0x1145   :  { %1650 = vrot.lane.b32.xlu2 %v3203_v17, %s2861_s12 }
0x114d   :  { %1656 = vrot.lane.b32.xlu2 %v3404_v41, %s2861_s12 }
0x1155   :  { %1684 = vrot.lane.b32.xlu2 %v3262_v22, %s2862_s13 }
0x115d   :  { %1690 = vrot.lane.b32.xlu2 %v3501_v39, %s2862_s13 }
0x117f   :  { %v1446_v24 = vpop.permute.xlu2 %1445 }
0x1180   :  { %v1448_v26 = vadd.f32 %v1446_v24, %v1438_v8 }
0x1182   :  { %2633 = vtanh.f32 %v1448_v26 }
0x1187   :  { %v1617_v52 = vpop.permute.xlu2 %1616 }
0x1188   :  { %v2634_v27 = vpop.eup %2633  ;;  %v1640_v62 = vmax.f32 %v3590_v20, %v1617_v52 }
0x1189   :  { %1451 = vrot.lane.b32.xlu0 %v2634_v27, %s2861_s12 }
0x118f   :  { %v1623_v54 = vpop.permute.xlu2 %1622 }
0x1190   :  { %v1643_v34 = vmax.f32 %v3324_v29, %v1623_v54 }
0x1191   :  { %1618 = vrot.lane.b32.xlu0 %v3203_v17, %s2863_s4 }
0x1197   :  { %v1629_v55 = vpop.permute.xlu2 %1628 }
0x1198   :  { %v1646_v12 = vmax.f32 %v3577_v44, %v1629_v55 }
0x1199   :  { %1624 = vrot.lane.b32.xlu0 %v3404_v41, %s2863_s4 }
0x119f   :  { %v1651_v57 = vpop.permute.xlu2 %1650 }
0x11a1   :  { %1652 = vrot.lane.b32.xlu0 %v3262_v22, %s2861_s12 }
0x11a7   :  { %v1657_v25 = vpop.permute.xlu2 %1656 }
0x11a9   :  { %1658 = vrot.lane.b32.xlu0 %v3501_v39, %s2861_s12 }
0x11af   :  { %v1685_v51 = vpop.permute.xlu2 %1684 }
0x11b1   :  { %1680 = vrot.lane.b32.xlu0 %v3590_v20, %s2862_s13 }
0x11b7   :  { %v1691_v49 = vpop.permute.xlu2 %1690 }
0x11b9   :  { %1686 = vrot.lane.b32.xlu0 %v3324_v29, %s2862_s13 }
0x11c1   :  { %1692 = vrot.lane.b32.xlu0 %v3577_v44, %s2862_s13 }
0x11fb   :  { %v1452_v28 = vpop.permute.xlu0 %1451 }
0x11fc   :  { %v1454_v50 = vmul.f32 %v1452_v28, %v1435_v18 }
0x11fe   :  { %1456 = vrot.lane.b32.xlu1 %v1454_v50, %s2862_s13  ;;  %v3681_v50 = vld [vmem:[#allocation2 + $0x30] sm:$0xff] }
0x1203   :  { %v1619_v21 = vpop.permute.xlu0 %1618 }
0x1204   :  { %v1641_v8 = vmax.f32 %v3673_v19, %v1619_v21 }
0x1206   :  { %1620 = vrot.lane.b32.xlu1 %v3262_v22, %s2863_s4 }
0x120b   :  { %v1625_v31 = vpop.permute.xlu0 %1624 }
0x120c   :  { %v1644_v52 = vmax.f32 %v3404_v41, %v1625_v31 }
0x120e   :  { %1626 = vrot.lane.b32.xlu1 %v3501_v39, %s2863_s4  ;;  %v1676_v55 = vmax.f32 %v1644_v52, %v1657_v25  ;;  %v1602_v52 = vld [vmem:[#allocation2 + $0x110] sm:$0xff] }
0x1216   :  { %1648 = vrot.lane.b32.xlu1 %v3590_v20, %s2861_s12 }
0x121e   :  { %1654 = vrot.lane.b32.xlu1 %v3324_v29, %s2861_s12 }
0x1226   :  { %1660 = vrot.lane.b32.xlu1 %v3577_v44, %s2861_s12 }
0x122e   :  { %1682 = vrot.lane.b32.xlu1 %v3203_v17, %s2862_s13  ;;  %v1653_v17 = vpop.permute.xlu0 %1652 }
0x1236   :  { %1688 = vrot.lane.b32.xlu1 %v3404_v41, %s2862_s13  ;;  %v1659_v2 = vpop.permute.xlu0 %1658 }
0x123e   :  { %v1681_v59 = vpop.permute.xlu0 %1680 }
0x1246   :  { %v1687_v5 = vpop.permute.xlu0 %1686 }
0x124e   :  { %v1693_v18 = vpop.permute.xlu0 %1692 }
0x1270   :  { %v1457_v32 = vpop.permute.xlu1 %1456 }
0x1271   :  { %2522 = vst.msk [vmem:[%s4223_s8 + $0x38] sm:$0xff] %vm186_vm6, %v1457_v32  ;;  %2523 = vmatmul.msk.f32.vlgmr.msrb.gmra.mxu0 %vm186_vm6, %v1457_v32  ;;  %2524 = vmatmul.msk.f32.vlgmr.msrb.gmra.mxu1 %vm186_vm6, %v1457_v32 }
0x1272   :  { %2525 = vmatmul.msk.f32.vlgmr.msrb.gmra.mxu2 %vm186_vm6, %v1457_v32  ;;  %2526 = vmatmul.msk.f32.vlgmr.msrb.gmra.mxu3 %vm186_vm6, %v1457_v32 }
0x1278   :  { %v1621_v60 = vpop.permute.xlu1 %1620 }
0x1279   :  { %v1642_v58 = vmax.f32 %v3262_v22, %v1621_v60  ;;  %2527 = vmatmul.msk.f32.vlgmr.msra.gmra.mxu0 %vm186_vm6, %v1457_v32 }
0x127b   :  { %v1674_v33 = vmax.f32 %v1642_v58, %v1653_v17 }
0x127d   :  { %v1706_v7 = vmax.f32 %v1674_v33, %v1685_v51 }
0x127f   :  { %v3648_v37 = vmax.f32 %v1706_v7, %v3265_v23 }
0x1280   :  { %v1627_v53 = vpop.permute.xlu1 %1626 }
0x1281   :  { %v1645_v46 = vmax.f32 %v3501_v39, %v1627_v53  ;;  %1764 = vrot.lane.b32.xlu1 %v3648_v37, %s2862_s13 }
0x1283   :  { %v1677_v47 = vmax.f32 %v1645_v46, %v1659_v2 }
0x1285   :  { %v1709_v56 = vmax.f32 %v1677_v47, %v1691_v49 }
0x1287   :  { %v3655_v3 = vmax.f32 %v1709_v56, %v3504_v40 }
0x1288   :  { %v1649_v63 = vpop.permute.xlu1 %1648 }
0x1289   :  { %v1672_v0 = vmax.f32 %v1640_v62, %v1649_v63  ;;  %1770 = vrot.lane.b32.xlu1 %v3655_v3, %s2862_s13 }
0x128b   :  { %v1704_v23 = vmax.f32 %v1672_v0, %v1681_v59 }
0x128d   :  { %v3662_v6 = vmax.f32 %v1704_v23, %v3659_v11 }
0x128f   :  { %1760 = vrot.lane.b32.xlu2 %v3662_v6, %s2862_s13 }
0x1290   :  { %v1655_v43 = vpop.permute.xlu1 %1654 }
0x1291   :  { %v1675_v40 = vmax.f32 %v1643_v34, %v1655_v43 }
0x1293   :  { %v1707_v9 = vmax.f32 %v1675_v40, %v1687_v5 }
0x1295   :  { %v3668_v10 = vmax.f32 %v1707_v9, %v3327_v30  ;;  %v1673_v30 = vmax.f32 %v1641_v8, %v1651_v57 }
0x1297   :  { %1766 = vrot.lane.b32.xlu2 %v3668_v10, %s2862_s13 }
0x1298   :  { %v1661_v13 = vpop.permute.xlu1 %1660 }
0x1299   :  { %v1678_v14 = vmax.f32 %v1646_v12, %v1661_v13  ;;  %v1592_v12 = vld [vmem:[#allocation2 + $0xc0] sm:$0xff] }
0x129b   :  { %v1710_v24 = vmax.f32 %v1678_v14, %v1693_v18  ;;  %v2235_v14 = vmax.f32 %v1592_v12, 0.0  ;;  %v2234_v18 = vmax.f32 %v3397_v38, 0.0  ;;  %v1582_v38 = vld [vmem:[#allocation2 + $0x70] sm:$0xff] }
0x129d   :  { %v3677_v26 = vmax.f32 %v1710_v24, %v3580_v45 }
0x129f   :  { %1772 = vrot.lane.b32.xlu2 %v3677_v26, %s2862_s13 }
0x12a0   :  { %v1683_v27 = vpop.permute.xlu1 %1682 }
0x12a1   :  { %v1705_v28 = vmax.f32 %v1673_v30, %v1683_v27  ;;  %v3735_v30 = vld [vmem:[#allocation2 + $0x18] sm:$0xff] }
0x12a3   :  { %v3685_v54 = vmax.f32 %v1705_v28, %v3681_v50 }
0x12a5   :  { %1762 = vrot.lane.b32.xlu0 %v3685_v54, %s2862_s13 }
0x12a8   :  { %v1689_v21 = vpop.permute.xlu1 %1688 }
0x12a9   :  { %v1708_v32 = vmax.f32 %v1676_v55, %v1689_v21  ;;  %v2226_v55 = vmax.f32 %v3735_v30, 0.0  ;;  %v2239_v21 = vmax.f32 %v1602_v52, 0.0 }
0x12ab   :  { %v3690_v17 = vmax.f32 %v1708_v32, %v3407_v42 }
0x12ad   :  { %1768 = vrot.lane.b32.xlu0 %v3690_v17, %s2862_s13 }
0x12e9   :  { %v1761_v57 = vpop.permute.xlu2 %1760 }
0x12ea   :  { %v1784_v60 = vsub.f32 %v3590_v20, %v1761_v57  ;;  %v1581_v57 = vld [vmem:[#allocation2 + $0x68] sm:$0xff] }
0x12ec   :  { %v1792_v58 = vmul.f32 1.442695, %v1784_v60  ;;  %v2231_v60 = vmax.f32 %v1582_v38, 0.0 }
0x12ee   :  { %2635 = vpow2.f32 %v1792_v58  ;;  %v1480_v31 = vpop.f32.mrf.mxu0  ;;  %v1500_v51 = vpop.f32.mrf.mxu1  ;;  %v2230_v58 = vmax.f32 %v1581_v57, 0.0 }
0x12ef   :  { %v3696_v33 = vadd.f32 %v1480_v31, %v3134_v1  ;;  %v3699_v25 = vadd.f32 %v1500_v51, %v3136_v4  ;;  %v1597_v31 = vld [vmem:[#allocation2 + $0xe8] sm:$0xff] }
0x12f0   :  { %v2237_v51 = vmax.f32 %v1597_v31, 0.0 }
0x12f1   :  { %1563 = vst [vmem:[#allocation2 + $0x118] sm:$0xff] %v3696_v33  ;;  %v1767_v42 = vpop.permute.xlu2 %1766 }
0x12f2   :  { %1564 = vst [vmem:[#allocation2 + $0x120] sm:$0xff] %v3699_v25  ;;  %v1787_v2 = vsub.f32 %v3324_v29, %v1767_v42  ;;  %v1576_v42 = vld [vmem:[#allocation2 + $0x40] sm:$0xff] }
0x12f3   :  { %v1765_v7 = vpop.permute.xlu1 %1764 }
0x12f4   :  { %v2636_v53 = vpop.eup %2635  ;;  %v1798_v46 = vmul.f32 1.442695, %v1787_v2  ;;  %v1786_v47 = vsub.f32 %v3262_v22, %v1765_v7  ;;  %v2228_v7 = vmax.f32 %v1576_v42, 0.0 }
0x12f5   :  { %v1520_v49 = vpop.f32.mrf.mxu2  ;;  %v1540_v56 = vpop.f32.mrf.mxu3  ;;  %1816 = vrot.lane.b32.xlu1 %v2636_v53, %s2863_s4  ;;  %v1577_v53 = vld [vmem:[#allocation2 + $0x48] sm:$0xff] }
0x12f6   :  { %2637 = vpow2.f32 %v1798_v46  ;;  %v1796_v1 = vmul.f32 1.442695, %v1786_v47  ;;  %v1521_v4 = vadd.f32 %v1520_v49, %v3131_v61  ;;  %v3708_v59 = vadd.f32 %v1540_v56, %v3144_v15  ;;  %v1560_v62 = vpop.f32.mrf.mxu0  ;;  %v1572_v49 = vld [vmem:[#allocation2 + $0x20] sm:$0xff] }
0x12f7   :  { %v1561_v63 = vadd.f32 %v1560_v62, %v3146_v16  ;;  %v2238_v46 = vmax.f32 %v3570_v36, 0.0  ;;  %v2229_v47 = vmax.f32 %v1577_v53, 0.0  ;;  %v2227_v56 = vmax.f32 %v1572_v49, 0.0 }
0x12f8   :  { %2639 = vpow2.f32 %v1796_v1  ;;  %2445 = vst [vmem:[%s4224_s9 + $0xf0] sm:$0xff] %v1521_v4  ;;  %v2240_v2 = vmax.f32 %v3708_v59, 0.0  ;;  %v1587_v1 = vld [vmem:[#allocation2 + $0x98] sm:$0xff]  ;;  %v2236_v36 = vmax.f32 %v3514_v35, 0.0  ;;  %v2232_v35 = vmax.f32 %v3332_v48, 0.0 }
0x12f9   :  { %v1773_v22 = vpop.permute.xlu2 %1772  ;;  %1566 = vst [vmem:[#allocation2 + $0x130] sm:$0xff] %v3708_v59  ;;  %v2233_v4 = vmax.f32 %v1587_v1, 0.0  ;;  %v2245_v48 = vld [vmem:[%s4221_s6 + $0x18] sm:$0xff] }
0x12fa   :  { %v1790_v29 = vsub.f32 %v3577_v44, %v1773_v22  ;;  %1567 = vst.msk [vmem:[#allocation2 + $0x138] sm:$0xff] %vm186_vm6, %v1561_v63  ;;  %v2249_v63 = vld [vmem:[%s4221_s6 + $0x38] sm:$0xff]  ;;  %v2248_v22 = vld [vmem:[%s4221_s6 + $0x30] sm:$0xff] }
0x12fb   :  { %v1771_v0 = vpop.permute.xlu1 %1770  ;;  %2537 = vmatpush.msra.mxu2 %v2249_v63  ;;  %2538 = vmatpush.msra.mxu3 %v2249_v63 }
0x12fc   :  { %v2638_v61 = vpop.eup %2637  ;;  %v1804_v23 = vmul.f32 1.442695, %v1790_v29  ;;  %v1789_v15 = vsub.f32 %v3501_v39, %v1771_v0  ;;  %2536 = vmatpush.msra.mxu1 %v2249_v63  ;;  %2334 = vmatpush.msrb.mxu0 %v2249_v63  ;;  %v2247_v0 = vld [vmem:[%s4221_s6 + $0x28] sm:$0xff] }
0x12fd   :  { %1822 = vrot.lane.b32.xlu1 %v2638_v61, %s2863_s4  ;;  %2540 = vmatpush.msra.mxu2 %v2248_v22  ;;  %v2246_v61 = vld [vmem:[%s4221_s6 + $0x20] sm:$0xff] }
0x12fe   :  { %v2640_v16 = vpop.eup %2639  ;;  %2641 = vpow2.f32 %v1804_v23  ;;  %v1802_v34 = vmul.f32 1.442695, %v1789_v15  ;;  %2541 = vmatpush.msra.mxu3 %v2248_v22  ;;  %2539 = vmatpush.msra.mxu1 %v2248_v22  ;;  %v2244_v15 = vld [vmem:[%s4221_s6 + $0x10] sm:$0xff] }
0x12ff   :  { %1820 = vrot.lane.b32.xlu0 %v2640_v16, %s2863_s4  ;;  %2335 = vmatpush.msrb.mxu0 %v2248_v22 }
0x1300   :  { %2643 = vpow2.f32 %v1802_v34  ;;  %2543 = vmatpush.msra.mxu2 %v2247_v0  ;;  %2544 = vmatpush.msra.mxu3 %v2247_v0  ;;  %v2243_v34 = vld [vmem:[%s4221_s6 + $0x8] sm:$0xff] }
0x1301   :  { %v1607_v59 = vld [vmem:[#allocation2 + $0x138] sm:$0xff]  ;;  %2542 = vmatpush.msra.mxu1 %v2247_v0  ;;  %2336 = vmatpush.msrb.mxu0 %v2247_v0 }
0x1302   :  { %v2241_v62 = vmax.f32 %v1607_v59, 0.0  ;;  %2546 = vmatpush.msra.mxu2 %v2246_v61  ;;  %2547 = vmatpush.msra.mxu3 %v2246_v61 }
0x1303   :  { %2545 = vmatpush.msra.mxu1 %v2246_v61  ;;  %2337 = vmatpush.msrb.mxu0 %v2246_v61 }
0x1304   :  { %v2642_v5 = vpop.eup %2641  ;;  %2549 = vmatpush.msra.mxu2 %v2245_v48  ;;  %2550 = vmatpush.msra.mxu3 %v2245_v48 }
0x1305   :  { %1828 = vrot.lane.b32.xlu1 %v2642_v5, %s2863_s4  ;;  %2548 = vmatpush.msra.mxu1 %v2245_v48  ;;  %v2242_v5 = vld [vmem:[%s4221_s6] sm:$0xff] }
0x1306   :  { %v2644_v43 = vpop.eup %2643  ;;  %2552 = vmatpush.msra.mxu2 %v2244_v15  ;;  %2338 = vmatpush.msrb.mxu0 %v2245_v48 }
0x1307   :  { %1826 = vrot.lane.b32.xlu0 %v2644_v43, %s2863_s4  ;;  %2553 = vmatpush.msra.mxu3 %v2244_v15 }
0x1308   :  { %2551 = vmatpush.msra.mxu1 %v2244_v15  ;;  %2555 = vmatpush.msra.mxu2 %v2243_v34 }
0x1309   :  { %2339 = vmatpush.msrb.mxu0 %v2244_v15  ;;  %2556 = vmatpush.msra.mxu3 %v2243_v34 }
0x130a   :  { %2554 = vmatpush.msra.mxu1 %v2243_v34  ;;  %2558 = vmatpush.msra.mxu2 %v2242_v5 }
0x130b   :  { %2340 = vmatpush.msrb.mxu0 %v2243_v34  ;;  %2559 = vmatpush.msra.mxu3 %v2242_v5 }
0x130c   :  { %2557 = vmatpush.msra.mxu1 %v2242_v5 }
0x130d   :  { %1850 = vrot.lane.b32.xlu1 %v3685_v54, %s2861_s12  ;;  %2341 = vmatpush.msrb.mxu0 %v2242_v5 }
0x130f   :  { %1848 = vrot.lane.b32.xlu0 %v3662_v6, %s2861_s12 }
0x1315   :  { %1856 = vrot.lane.b32.xlu1 %v3690_v17, %s2861_s12 }
0x1317   :  { %v1763_v40 = vpop.permute.xlu0 %1762  ;;  %1854 = vrot.lane.b32.xlu0 %v3668_v10, %s2861_s12 }
0x1318   :  { %v1785_v9 = vsub.f32 %v3673_v19, %v1763_v40 }
0x131a   :  { %v1794_v13 = vmul.f32 1.442695, %v1785_v9 }
0x131c   :  { %2645 = vpow2.f32 %v1794_v13 }
0x131d   :  { %2288 = vrot.lane.b32.xlu1 %v2235_v14, %s2862_s13 }
0x131f   :  { %v1769_v8 = vpop.permute.xlu0 %1768  ;;  %2286 = vrot.lane.b32.xlu0 %v2234_v18, %s2862_s13 }
0x1320   :  { %v1788_v24 = vsub.f32 %v3404_v41, %v1769_v8 }
0x1322   :  { %v2646_v27 = vpop.eup %2645  ;;  %v1800_v28 = vmul.f32 1.442695, %v1788_v24 }
0x1323   :  { %1818 = vrot.lane.b32.xlu2 %v2646_v27, %s2863_s4 }
0x1324   :  { %2647 = vpow2.f32 %v1800_v28 }
0x1325   :  { %2270 = vrot.lane.b32.xlu1 %v2226_v55, %s2862_s13 }
0x1327   :  { %2296 = vrot.lane.b32.xlu0 %v2239_v21, %s2862_s13 }
0x132a   :  { %v2648_v32 = vpop.eup %2647 }
0x132b   :  { %1824 = vrot.lane.b32.xlu2 %v2648_v32, %s2863_s4  ;;  %v3811_v32 = vld [vmem:[#allocation2 + $0x78] sm:$0xff] }
0x132d   :  { %2280 = vrot.lane.b32.xlu1 %v2231_v60, %s2862_s13 }
0x132f   :  { %2278 = vrot.lane.b32.xlu0 %v2230_v58, %s2862_s13 }
0x1333   :  { %1852 = vrot.lane.b32.xlu2 %v3648_v37, %s2861_s12 }
0x1335   :  { %1694 = vrot.lane.b32.xlu1 %v3696_v33, %s2862_s13 }
0x1337   :  { %2292 = vrot.lane.b32.xlu0 %v2237_v51, %s2862_s13  ;;  %v3816_v51 = vld [vmem:[#allocation2 + $0x50] sm:$0xff] }
0x133b   :  { %1858 = vrot.lane.b32.xlu2 %v3655_v3, %s2861_s12 }
0x133d   :  { %2298 = vrot.lane.b32.xlu1 %v2240_v2, %s2862_s13 }
0x133f   :  { %2274 = vrot.lane.b32.xlu0 %v2228_v7, %s2862_s13 }
0x1343   :  { %2294 = vrot.lane.b32.xlu2 %v2238_v46, %s2862_s13 }
0x1345   :  { %2276 = vrot.lane.b32.xlu1 %v2229_v47, %s2862_s13 }
0x1347   :  { %1630 = vrot.lane.b32.xlu0 %v3696_v33, %s2863_s4 }
0x134b   :  { %2272 = vrot.lane.b32.xlu2 %v2227_v56, %s2862_s13 }
0x134d   :  { %1860 = vrot.lane.b32.xlu1 %v3677_v26, %s2861_s12 }
0x134f   :  { %2284 = vrot.lane.b32.xlu0 %v2233_v4, %s2862_s13 }
0x1353   :  { %2290 = vrot.lane.b32.xlu2 %v2236_v36, %s2862_s13 }
0x135b   :  { %1662 = vrot.lane.b32.xlu2 %v3696_v33, %s2861_s12 }
0x1363   :  { %2300 = vrot.lane.b32.xlu2 %v2241_v62, %s2862_s13 }
0x1367   :  { %v3774_v29 = vpop.permute.xlu1 %1816 }
0x136b   :  { %2282 = vrot.lane.b32.xlu2 %v2232_v35, %s2862_s13 }
0x136f   :  { %v3787_v23 = vpop.permute.xlu1 %1822 }
0x1371   :  { %v3792_v16 = vpop.permute.xlu0 %1820 }
0x1377   :  { %v3800_v43 = vpop.permute.xlu1 %1828 }
0x1379   :  { %v3802_v40 = vpop.permute.xlu0 %1826 }
0x137d   :  { %v3804_v9 = vpop.permute.xlu2 %1818 }
0x137f   :  { %v1851_v12 = vpop.permute.xlu1 %1850 }
0x1380   :  { %v1873_v13 = vsub.f32 %v3673_v19, %v1851_v12 }
0x1381   :  { %v1849_v14 = vpop.permute.xlu0 %1848 }
0x1382   :  { %v1882_v18 = vmul.f32 1.442695, %v1873_v13  ;;  %v1872_v8 = vsub.f32 %v3590_v20, %v1849_v14 }
0x1384   :  { %2649 = vpow2.f32 %v1882_v18  ;;  %v1880_v24 = vmul.f32 1.442695, %v1872_v8 }
0x1385   :  { %v3808_v27 = vpop.permute.xlu2 %1824 }
0x1386   :  { %2651 = vpow2.f32 %v1880_v24 }
0x1387   :  { %v1857_v28 = vpop.permute.xlu1 %1856 }
0x1388   :  { %v1876_v52 = vsub.f32 %v3404_v41, %v1857_v28 }
0x1389   :  { %v1855_v55 = vpop.permute.xlu0 %1854 }
0x138a   :  { %v2650_v21 = vpop.eup %2649  ;;  %v1888_v38 = vmul.f32 1.442695, %v1876_v52  ;;  %v1875_v57 = vsub.f32 %v3811_v32, %v1855_v55 }
0x138b   :  { %1906 = vrot.lane.b32.xlu1 %v2650_v21, %s2861_s12 }
0x138c   :  { %v2652_v60 = vpop.eup %2651  ;;  %2653 = vpow2.f32 %v1888_v38  ;;  %v1886_v58 = vmul.f32 1.442695, %v1875_v57 }
0x138d   :  { %1904 = vrot.lane.b32.xlu0 %v2652_v60, %s2861_s12  ;;  %v1853_v31 = vpop.permute.xlu2 %1852 }
0x138e   :  { %2655 = vpow2.f32 %v1886_v58  ;;  %v1874_v41 = vsub.f32 %v3816_v51, %v1853_v31 }
0x138f   :  { %v2289_v42 = vpop.permute.xlu1 %2288 }
0x1390   :  { %v1884_v2 = vmul.f32 1.442695, %v1874_v41 }
0x1391   :  { %v2287_v7 = vpop.permute.xlu0 %2286 }
0x1392   :  { %v2654_v53 = vpop.eup %2653  ;;  %2657 = vpow2.f32 %v1884_v2  ;;  %v2306_v46 = vsel %vm186_vm6, %v2287_v7, %v2289_v42 }
0x1393   :  { %1912 = vrot.lane.b32.xlu1 %v2654_v53, %s2861_s12  ;;  %2532 = vmatmul.msk.f32.vlgmr.msra.gmra.mxu2 %vm2208_vm5, %v2306_v46 }
0x1394   :  { %v2656_v47 = vpop.eup %2655 }
0x1395   :  { %1910 = vrot.lane.b32.xlu0 %v2656_v47, %s2861_s12  ;;  %v1859_v49 = vpop.permute.xlu2 %1858  ;;  %v1722_v47 = vsub.f32 %v3816_v51, %v3648_v37 }
0x1396   :  { %v1877_v56 = vsub.f32 %v3501_v39, %v1859_v49 }
0x1397   :  { %v2271_v1 = vpop.permute.xlu1 %2270  ;;  %v1732_v49 = vmul.f32 1.442695, %v1722_v47 }
0x1398   :  { %v2658_v4 = vpop.eup %2657  ;;  %v1890_v36 = vmul.f32 1.442695, %v1877_v56  ;;  %v1725_v56 = vsub.f32 %v3501_v39, %v3655_v3 }
0x1399   :  { %v2297_v59 = vpop.permute.xlu0 %2296  ;;  %1908 = vrot.lane.b32.xlu2 %v2658_v4, %s2861_s12  ;;  %v1720_v4 = vsub.f32 %v3590_v20, %v3662_v6 }
0x139a   :  { %2659 = vpow2.f32 %v1890_v36  ;;  %v1738_v36 = vmul.f32 1.442695, %v1725_v56 }
0x139b   :  { %1936 = vrot.lane.b32.xlu1 %v3662_v6, %s2863_s4 }
0x139d   :  { %v2295_v62 = vpop.permute.xlu2 %2294 }
0x139e   :  { %v2308_v63 = vsel %vm186_vm6, %v2295_v62, %v2297_v59 }
0x139f   :  { %v2281_v22 = vpop.permute.xlu1 %2280  ;;  %2534 = vmatmul.msk.f32.vlgmr.msra.gmra.mxu3 %vm2208_vm5, %v2308_v63 }
0x13a0   :  { %v2660_v35 = vpop.eup %2659 }
0x13a1   :  { %v2279_v0 = vpop.permute.xlu0 %2278  ;;  %1914 = vrot.lane.b32.xlu2 %v2660_v35, %s2861_s12 }
0x13a2   :  { %v2304_v61 = vsel %vm186_vm6, %v2279_v0, %v2281_v22  ;;  %v1728_v22 = vmul.f32 1.442695, %v1720_v4 }
0x13a3   :  { %1942 = vrot.lane.b32.xlu1 %v3668_v10, %s2863_s4  ;;  %2530 = vmatmul.msk.f32.vlgmr.msra.gmra.mxu1 %vm2208_vm5, %v2304_v61  ;;  %v3877_v61 = vld [vmem:[#allocation2 + $0xa0] sm:$0xff] }
0x13a4   :  { %v1724_v39 = vsub.f32 %v3877_v61, %v3690_v17 }
0x13a5   :  { %v2273_v48 = vpop.permute.xlu2 %2272 }
0x13a6   :  { %v2302_v15 = vsel %vm186_vm6, %v2271_v1, %v2273_v48  ;;  %v1721_v1 = vsub.f32 %v3673_v19, %v3685_v54  ;;  %v1723_v48 = vsub.f32 %v3811_v32, %v3668_v10 }
0x13a7   :  { %v1695_v34 = vpop.permute.xlu1 %1694  ;;  %2528 = vmatmul.msk.f32.vlgmr.msrb.gmra.mxu0 %vm2208_vm5, %v2302_v15 }
0x13a8   :  { %v1730_v62 = vmul.f32 1.442695, %v1721_v1 }
0x13a9   :  { %v2293_v5 = vpop.permute.xlu0 %2292  ;;  %1938 = vrot.lane.b32.xlu2 %v3685_v54, %s2863_s4 }
0x13ab   :  { %1948 = vrot.lane.b32.xlu1 %v3677_v26, %s2863_s4 }
0x13ad   :  { %v2291_v12 = vpop.permute.xlu2 %2290 }
0x13ae   :  { %v2307_v13 = vsel %vm186_vm6, %v2291_v12, %v2293_v5  ;;  %v1734_v12 = vmul.f32 1.442695, %v1723_v48 }
0x13af   :  { %v2299_v14 = vpop.permute.xlu1 %2298  ;;  %2533 = vmatmul.msk.f32.gmra.mxu2 %vm2208_vm5, %v2307_v13 }
0x13b1   :  { %v2275_v18 = vpop.permute.xlu0 %2274  ;;  %1944 = vrot.lane.b32.xlu2 %v3690_v17, %s2863_s4 }
0x13b5   :  { %v1663_v8 = vpop.permute.xlu2 %1662 }
0x13b7   :  { %v2277_v24 = vpop.permute.xlu1 %2276 }
0x13b8   :  { %v2303_v28 = vsel %vm186_vm6, %v2275_v18, %v2277_v24 }
0x13b9   :  { %v1631_v52 = vpop.permute.xlu0 %1630  ;;  %2529 = vmatmul.msk.f32.gmra.mxu0 %vm2208_vm5, %v2303_v28 }
0x13ba   :  { %v1647_v55 = vmax.f32 %v3696_v33, %v1631_v52 }
0x13bc   :  { %v1679_v21 = vmax.f32 %v1647_v55, %v1663_v8 }
0x13bd   :  { %v2301_v38 = vpop.permute.xlu2 %2300 }
0x13be   :  { %v1711_v57 = vmax.f32 %v1679_v21, %v1695_v34  ;;  %v2309_v60 = vsel %vm186_vm6, %v2299_v14, %v2301_v38  ;;  %v1736_v34 = vmul.f32 1.442695, %v1724_v39  ;;  %v1726_v39 = vsub.f32 %v3577_v44, %v3677_v26 }
0x13bf   :  { %v1861_v58 = vpop.permute.xlu1 %1860  ;;  %2535 = vmatmul.msk.f32.gmra.mxu3 %vm2208_vm5, %v2309_v60 }
0x13c0   :  { %v3850_v31 = vmax.f32 %v1711_v57, %v3699_v25  ;;  %v1878_v41 = vsub.f32 %v3577_v44, %v1861_v58  ;;  %v1740_v48 = vmul.f32 1.442695, %v1726_v39 }
0x13c1   :  { %v2285_v2 = vpop.permute.xlu0 %2284 }
0x13c2   :  { %v1892_v42 = vmul.f32 1.442695, %v1878_v41  ;;  %1862 = vrot.lane.b32.xlu2 %v3850_v31, %s2861_s12 }
0x13c4   :  { %2661 = vpow2.f32 %v1892_v42 }
0x13c5   :  { %v2283_v7 = vpop.permute.xlu2 %2282  ;;  %2663 = vpow2.f32 %v1732_v49 }
0x13c6   :  { %v2305_v53 = vsel %vm186_vm6, %v2283_v7, %v2285_v2  ;;  %2665 = vpow2.f32 %v1738_v36 }
0x13c7   :  { %2531 = vmatmul.msk.f32.gmra.mxu1 %vm2208_vm5, %v2305_v53  ;;  %2667 = vpow2.f32 %v1730_v62 }
0x13c8   :  { %2669 = vpow2.f32 %v1728_v22 }
0x13c9   :  { %2671 = vpow2.f32 %v1736_v34 }
0x13ca   :  { %v2662_v46 = vpop.eup %2661  ;;  %1950 = vrot.lane.b32.xlu2 %v3850_v31, %s2863_s4  ;;  %2673 = vpow2.f32 %v1734_v12 }
0x13cb   :  { %1916 = vrot.lane.b32.xlu0 %v2662_v46, %s2861_s12  ;;  %v2664_v59 = vpop.eup %2663 }
0x13cc   :  { %v1842_v63 = vadd.f32 %v2664_v59, %v3792_v16  ;;  %v2666_v15 = vpop.eup %2665 }
0x13cd   :  { %v1845_v5 = vadd.f32 %v2666_v15, %v3802_v40  ;;  %v2668_v16 = vpop.eup %2667 }
0x13ce   :  { %v1841_v14 = vadd.f32 %v2668_v16, %v3804_v9  ;;  %v2670_v8 = vpop.eup %2669 }
0x13cf   :  { %v1840_v28 = vadd.f32 %v2670_v8, %v3774_v29  ;;  %v2672_v38 = vpop.eup %2671 }
0x13d0   :  { %v1844_v57 = vadd.f32 %v2672_v38, %v3808_v27  ;;  %v2674_v9 = vpop.eup %2673 }
0x13d1   :  { %v1843_v41 = vadd.f32 %v2674_v9, %v3787_v23  ;;  %v2762_v9 = vld [vmem:[#allocation2 + $0xa8] sm:$0xff] }
0x13d3   :  { %1940 = vrot.lane.b32.xlu0 %v3648_v37, %s2863_s4 }
0x13db   :  { %1946 = vrot.lane.b32.xlu0 %v3655_v3, %s2863_s4 }
0x13e3   :  { %1774 = vrot.lane.b32.xlu0 %v3850_v31, %s2862_s13 }
0x13f3   :  { %v1909_v35 = vpop.permute.xlu2 %1908 }
0x13f4   :  { %v3875_v0 = vadd.f32 %v1909_v35, %v1842_v63 }
0x13fb   :  { %v1915_v13 = vpop.permute.xlu2 %1914 }
0x13fc   :  { %v3885_v18 = vadd.f32 %v1915_v13, %v1845_v5 }
0x13fd   :  { %v1907_v24 = vpop.permute.xlu1 %1906 }
0x13fe   :  { %v3888_v52 = vadd.f32 %v1907_v24, %v1841_v14  ;;  %v3914_v24 = vld [vmem:[#allocation2 + $0xc8] sm:$0xff] }
0x13ff   :  { %v1905_v55 = vpop.permute.xlu0 %1904 }
0x1400   :  { %v3890_v21 = vadd.f32 %v1905_v55, %v1840_v28 }
0x1403   :  { %v1939_v40 = vpop.permute.xlu2 %1938 }
0x1404   :  { %v1961_v60 = vsub.f32 %v3673_v19, %v1939_v40  ;;  %v2025_v40 = vsub.f32 %v3681_v50, %v3685_v54 }
0x1405   :  { %v1913_v58 = vpop.permute.xlu1 %1912 }
0x1406   :  { %v1970_v42 = vmul.f32 1.442695, %v1961_v60  ;;  %v3895_v2 = vadd.f32 %v1913_v58, %v1844_v57  ;;  %v2034_v60 = vmul.f32 1.442695, %v2025_v40  ;;  %v2028_v58 = vsub.f32 %v2762_v9, %v3690_v17 }
0x1407   :  { %v1911_v29 = vpop.permute.xlu0 %1910 }
0x1408   :  { %2675 = vpow2.f32 %v1970_v42  ;;  %v3897_v7 = vadd.f32 %v1911_v29, %v1843_v41  ;;  %v2040_v42 = vmul.f32 1.442695, %v2028_v58 }
0x140b   :  { %v1945_v53 = vpop.permute.xlu2 %1944 }
0x140c   :  { %v1964_v46 = vsub.f32 %v3877_v61, %v1945_v53 }
0x140d   :  { %v1937_v47 = vpop.permute.xlu1 %1936 }
0x140e   :  { %v2676_v49 = vpop.eup %2675  ;;  %v1976_v56 = vmul.f32 1.442695, %v1964_v46  ;;  %v1960_v27 = vsub.f32 %v3590_v20, %v1937_v47 }
0x140f   :  { %1994 = vrot.lane.b32.xlu2 %v2676_v49, %s2862_s13 }
0x1410   :  { %2677 = vpow2.f32 %v1976_v56  ;;  %v1968_v19 = vmul.f32 1.442695, %v1960_v27 }
0x1412   :  { %2679 = vpow2.f32 %v1968_v19 }
0x1415   :  { %v1943_v23 = vpop.permute.xlu1 %1942 }
0x1416   :  { %v2678_v1 = vpop.eup %2677  ;;  %v1963_v4 = vsub.f32 %v3811_v32, %v1943_v23 }
0x1417   :  { %2000 = vrot.lane.b32.xlu2 %v2678_v1, %s2862_s13 }
0x1418   :  { %v2680_v36 = vpop.eup %2679  ;;  %v1974_v59 = vmul.f32 1.442695, %v1963_v4 }
0x1419   :  { %1992 = vrot.lane.b32.xlu1 %v2680_v36, %s2862_s13 }
0x141a   :  { %2681 = vpow2.f32 %v1974_v59 }
0x141c   :  { %v3918_v38 = vpop.permute.xlu2 %1862 }
0x141d   :  { %v1949_v62 = vpop.permute.xlu1 %1948 }
0x141e   :  { %v1966_v63 = vsub.f32 %v3577_v44, %v1949_v62 }
0x1420   :  { %v2682_v20 = vpop.eup %2681  ;;  %v1980_v22 = vmul.f32 1.442695, %v1966_v63 }
0x1421   :  { %1998 = vrot.lane.b32.xlu1 %v2682_v20, %s2862_s13  ;;  %v2763_v20 = vld [vmem:[#allocation2 + $0x80] sm:$0xff] }
0x1422   :  { %2683 = vpow2.f32 %v1980_v22 }
0x1423   :  { %2685 = vpow2.f32 %v1740_v48 }
0x1424   :  { %v3923_v57 = vpop.permute.xlu2 %1950 }
0x1428   :  { %v2684_v35 = vpop.eup %2683 }
0x1429   :  { %2004 = vrot.lane.b32.xlu1 %v2684_v35, %s2862_s13  ;;  %v2686_v15 = vpop.eup %2685 }
0x142a   :  { %v1846_v34 = vadd.f32 %v2686_v15, %v3800_v43 }
0x143d   :  { %v1917_v5 = vpop.permute.xlu0 %1916 }
0x143e   :  { %v3911_v16 = vadd.f32 %v1917_v5, %v1846_v34  ;;  %v2030_v34 = vsub.f32 %v3580_v45, %v3677_v26 }
0x1445   :  { %v1941_v12 = vpop.permute.xlu0 %1940 }
0x1446   :  { %v1962_v13 = vsub.f32 %v3816_v51, %v1941_v12  ;;  %v2044_v12 = vmul.f32 1.442695, %v2030_v34 }
0x1448   :  { %v1972_v14 = vmul.f32 1.442695, %v1962_v13 }
0x144a   :  { %2687 = vpow2.f32 %v1972_v14 }
0x144d   :  { %v1947_v8 = vpop.permute.xlu0 %1946 }
0x144e   :  { %v1965_v28 = vsub.f32 %v3914_v24, %v1947_v8 }
0x1450   :  { %v2688_v55 = vpop.eup %2687  ;;  %v1978_v44 = vmul.f32 1.442695, %v1965_v28 }
0x1451   :  { %1996 = vrot.lane.b32.xlu0 %v2688_v55, %s2862_s13 }
0x1452   :  { %2689 = vpow2.f32 %v1978_v44 }
0x1453   :  { %2691 = vpow2.f32 %v2034_v60 }
0x1454   :  { %2693 = vpow2.f32 %v2040_v42 }
0x1458   :  { %v2690_v43 = vpop.eup %2689 }
0x1459   :  { %2002 = vrot.lane.b32.xlu0 %v2690_v43, %s2862_s13  ;;  %v2692_v53 = vpop.eup %2691 }
0x145a   :  { %v2694_v56 = vpop.eup %2693 }
0x1469   :  { %v1995_v41 = vpop.permute.xlu2 %1994 }
0x146a   :  { %v2017_v29 = vadd.f32 %v1995_v41, %v3888_v52 }
0x146c   :  { %v2049_v46 = vadd.f32 %v2692_v53, %v2017_v29 }
0x146e   :  { %2695 = vlog2.f32 %v2049_v46  ;;  %v2764_v46 = vld [vmem:[#allocation2 + $0xf8] sm:$0xff] }
0x1471   :  { %v2001_v47 = vpop.permute.xlu2 %2000 }
0x1472   :  { %v2020_v49 = vadd.f32 %v2001_v47, %v3895_v2 }
0x1474   :  { %v2696_v27 = vpop.eup %2695  ;;  %v2052_v19 = vadd.f32 %v2694_v56, %v2020_v49  ;;  %v2765_v56 = vld [vmem:[#allocation2 + $0x58] sm:$0xff] }
0x1475   :  { %v2059_v23 = vmul.f32 0.6931472, %v2696_v27  ;;  %v1775_v27 = vpop.permute.xlu0 %1774 }
0x1476   :  { %2697 = vlog2.f32 %v2052_v19 }
0x1477   :  { %v3929_v1 = vadd.f32 %v2059_v23, %v3685_v54  ;;  %v2024_v54 = vsub.f32 %v3659_v11, %v3662_v6  ;;  %v2766_v23 = vld [vmem:[#allocation2 + $0xd0] sm:$0xff] }
0x1479   :  { %v2193_v4 = vsub.f32 %v3681_v50, %v3929_v1  ;;  %2098 = vrot.lane.b32.xlu1 %v3929_v1, %s2862_s13 }
0x147b   :  { %v2400_v52 = vsel %vm186_vm6, %v2193_v4, %v3681_v50  ;;  %v2032_v50 = vmul.f32 1.442695, %v2024_v54  ;;  %v2029_v4 = vsub.f32 %v2766_v23, %v3655_v3 }
0x147c   :  { %v2698_v36 = vpop.eup %2697  ;;  %2420 = vst [vmem:[%s4224_s9 + $0x28] sm:$0xff] %v2400_v52 }
0x147d   :  { %v2065_v2 = vmul.f32 0.6931472, %v2698_v36  ;;  %2699 = vpow2.f32 %v2032_v50  ;;  %v2042_v36 = vmul.f32 1.442695, %v2029_v4 }
0x147f   :  { %v3941_v59 = vadd.f32 %v2065_v2, %v3690_v17  ;;  %v2027_v17 = vsub.f32 %v2763_v20, %v3668_v10 }
0x1481   :  { %v2196_v62 = vsub.f32 %v2762_v9, %v3941_v59  ;;  %2104 = vrot.lane.b32.xlu1 %v3941_v59, %s2862_s13  ;;  %v2038_v35 = vmul.f32 1.442695, %v2027_v17 }
0x1483   :  { %v2403_v63 = vsel %vm186_vm6, %v2196_v62, %v2762_v9  ;;  %v2700_v48 = vpop.eup %2699  ;;  %2701 = vpow2.f32 %v2038_v35 }
0x1484   :  { %2432 = vst [vmem:[%s4224_s9 + $0x88] sm:$0xff] %v2403_v63 }
0x1489   :  { %v2702_v14 = vpop.eup %2701 }
0x148b   :  { %v1993_v22 = vpop.permute.xlu1 %1992 }
0x148c   :  { %v2016_v39 = vadd.f32 %v1993_v22, %v3890_v21 }
0x148e   :  { %v2048_v15 = vadd.f32 %v2700_v48, %v2016_v39 }
0x1490   :  { %2703 = vlog2.f32 %v2048_v15 }
0x1491   :  { %2705 = vpow2.f32 %v2044_v12 }
0x1493   :  { %v1999_v5 = vpop.permute.xlu1 %1998 }
0x1494   :  { %v2019_v13 = vadd.f32 %v1999_v5, %v3897_v7 }
0x1496   :  { %v2704_v8 = vpop.eup %2703  ;;  %v2051_v28 = vadd.f32 %v2702_v14, %v2019_v13  ;;  %v1967_v13 = vsub.f32 %v3696_v33, %v3923_v57 }
0x1497   :  { %v2057_v55 = vmul.f32 0.6931472, %v2704_v8  ;;  %v2706_v40 = vpop.eup %2705  ;;  %v2349_v8 = vpop.f32.mrf.mxu1 }
0x1498   :  { %2707 = vlog2.f32 %v2051_v28  ;;  %v4035_v28 = vld [vmem:[%s4222_s7] ss:$0 sm:$0xff] }
0x1499   :  { %v3958_v44 = vadd.f32 %v2057_v55, %v3662_v6  ;;  %v1982_v55 = vmul.f32 1.442695, %v1967_v13 }
0x149b   :  { %v2192_v21 = vsub.f32 %v3659_v11, %v3958_v44  ;;  %v2005_v43 = vpop.permute.xlu1 %2004  ;;  %2096 = vrot.lane.b32.xlu0 %v3958_v44, %s2862_s13 }
0x149c   :  { %v2022_v45 = vadd.f32 %v2005_v43, %v3911_v16  ;;  %v1879_v16 = vsub.f32 %v3696_v33, %v3918_v38 }
0x149d   :  { %v2399_v7 = vsel %vm186_vm6, %v2192_v21, %v3659_v11 }
0x149e   :  { %v2708_v60 = vpop.eup %2707  ;;  %2416 = vst [vmem:[%s4224_s9 + $0x8] sm:$0xff] %v2399_v7  ;;  %v2054_v6 = vadd.f32 %v2706_v40, %v2022_v45  ;;  %v1894_v53 = vmul.f32 1.442695, %v1879_v16 }
0x149f   :  { %v2063_v9 = vmul.f32 0.6931472, %v2708_v60  ;;  %v2352_v43 = vpop.f32.mrf.mxu1 }
0x14a0   :  { %2709 = vlog2.f32 %v2054_v6  ;;  %v2353_v45 = vadd.f32 %v4035_v28, %v2352_v43  ;;  %v2355_v6 = vpop.f32.mrf.mxu2  ;;  %v2767_v43 = vld [vmem:[#allocation2] sm:$0xff] }
0x14a1   :  { %v3971_v58 = vadd.f32 %v2063_v9, %v3668_v10  ;;  %2711 = vpow2.f32 %v1894_v53  ;;  %v2356_v9 = vadd.f32 %v4035_v28, %v2355_v6 }
0x14a3   :  { %v2195_v41 = vsub.f32 %v2763_v20, %v3971_v58  ;;  %2102 = vrot.lane.b32.xlu0 %v3971_v58, %s2862_s13 }
0x14a5   :  { %v2402_v11 = vsel %vm186_vm6, %v2195_v41, %v2763_v20 }
0x14a6   :  { %v2710_v42 = vpop.eup %2709  ;;  %2428 = vst [vmem:[%s4224_s9 + $0x68] sm:$0xff] %v2402_v11  ;;  %v2350_v11 = vadd.f32 %v4035_v28, %v2349_v8 }
0x14a7   :  { %v2069_v29 = vmul.f32 0.6931472, %v2710_v42  ;;  %v2712_v49 = vpop.eup %2711 }
0x14a9   :  { %v3983_v10 = vadd.f32 %v2069_v29, %v3677_v26  ;;  %v2026_v26 = vsub.f32 %v2765_v56, %v3648_v37 }
0x14ab   :  { %v2198_v47 = vsub.f32 %v2764_v46, %v3983_v10  ;;  %2108 = vrot.lane.b32.xlu0 %v3983_v10, %s2862_s13  ;;  %v2036_v19 = vmul.f32 1.442695, %v2026_v26  ;;  %v2031_v26 = vsub.f32 %v3699_v25, %v3850_v31 }
0x14ad   :  { %v2405_v38 = vsel %vm186_vm6, %v2198_v47, %v2764_v46  ;;  %2713 = vpow2.f32 %v2036_v19  ;;  %v1727_v46 = vsub.f32 %v3696_v33, %v3850_v31 }
0x14ae   :  { %2440 = vst [vmem:[%s4224_s9 + $0xc8] sm:$0xff] %v2405_v38  ;;  %2715 = vpow2.f32 %v2042_v36 }
0x14b3   :  { %1918 = vrot.lane.b32.xlu0 %v2712_v49, %s2861_s12  ;;  %v2714_v54 = vpop.eup %2713 }
0x14b4   :  { %v2716_v20 = vpop.eup %2715 }
0x14bb   :  { %2130 = vrot.lane.b32.xlu0 %v3929_v1, %s2861_s12 }
0x14c3   :  { %v1997_v52 = vpop.permute.xlu0 %1996  ;;  %2136 = vrot.lane.b32.xlu0 %v3941_v59, %s2861_s12 }
0x14c4   :  { %v2018_v2 = vadd.f32 %v1997_v52, %v3875_v0  ;;  %v1791_v0 = vsub.f32 %v3696_v33, %v1775_v27 }
0x14c6   :  { %v2050_v62 = vadd.f32 %v2714_v54, %v2018_v2  ;;  %v1806_v34 = vmul.f32 1.442695, %v1791_v0 }
0x14c8   :  { %2717 = vlog2.f32 %v2050_v62 }
0x14cb   :  { %v2003_v63 = vpop.permute.xlu0 %2002 }
0x14cc   :  { %v2021_v50 = vadd.f32 %v2003_v63, %v3885_v18 }
0x14ce   :  { %v2718_v17 = vpop.eup %2717  ;;  %v2053_v22 = vadd.f32 %v2716_v20, %v2021_v50 }
0x14cf   :  { %v2061_v35 = vmul.f32 0.6931472, %v2718_v17 }
0x14d0   :  { %2719 = vlog2.f32 %v2053_v22 }
0x14d1   :  { %v4002_v39 = vadd.f32 %v2061_v35, %v3648_v37  ;;  %2721 = vpow2.f32 %v1806_v34 }
0x14d2   :  { %2723 = vpow2.f32 %v1982_v55 }
0x14d3   :  { %v2194_v48 = vsub.f32 %v2765_v56, %v4002_v39  ;;  %2100 = vrot.lane.b32.xlu2 %v4002_v39, %s2862_s13  ;;  %2164 = vrot.lane.b32.xlu0 %v4002_v39, %s2863_s4  ;;  %v2082_v63 = vsub.f32 %v3816_v51, %v4002_v39 }
0x14d4   :  { %2132 = vrot.lane.b32.xlu1 %v4002_v39, %s2861_s12 }
0x14d5   :  { %v2401_v18 = vsel %vm186_vm6, %v2194_v48, %v2765_v56  ;;  %v1742_v56 = vmul.f32 1.442695, %v1727_v46 }
0x14d6   :  { %v2720_v15 = vpop.eup %2719  ;;  %2424 = vst [vmem:[%s4224_s9 + $0x48] sm:$0xff] %v2401_v18 }
0x14d7   :  { %v2067_v37 = vmul.f32 0.6931472, %v2720_v15  ;;  %v2722_v21 = vpop.eup %2721  ;;  %2725 = vpow2.f32 %v1742_v56 }
0x14d8   :  { %v2724_v40 = vpop.eup %2723 }
0x14d9   :  { %v4017_v5 = vadd.f32 %v2067_v37, %v3655_v3  ;;  %v2343_v3 = vpop.f32.mrf.mxu0 }
0x14da   :  { %v2344_v57 = vadd.f32 %v4035_v28, %v2343_v3  ;;  %v2361_v3 = vpop.f32.mrf.mxu3 }
0x14db   :  { %v2197_v12 = vsub.f32 %v2766_v23, %v4017_v5  ;;  %2106 = vrot.lane.b32.xlu2 %v4017_v5, %s2862_s13  ;;  %2170 = vrot.lane.b32.xlu0 %v4017_v5, %s2863_s4  ;;  %v2085_v34 = vsub.f32 %v3914_v24, %v4017_v5  ;;  %v2362_v56 = vadd.f32 %v4035_v28, %v2361_v3 }
0x14dc   :  { %2138 = vrot.lane.b32.xlu1 %v4017_v5, %s2861_s12  ;;  %v2080_v5 = vsub.f32 %v2767_v43, %v3958_v44 }
0x14dd   :  { %v2404_v14 = vsel %vm186_vm6, %v2197_v12, %v2766_v23  ;;  %v2046_v23 = vmul.f32 1.442695, %v2031_v26  ;;  %v2726_v52 = vpop.eup %2725 }
0x14de   :  { %2436 = vst [vmem:[%s4224_s9 + $0xa8] sm:$0xff] %v2404_v14 }
0x14df   :  { %2727 = vpow2.f32 %v2046_v23 }
0x14e1   :  { %v2346_v7 = vpop.f32.mrf.mxu0 }
0x14e2   :  { %v2347_v60 = vadd.f32 %v4035_v28, %v2346_v7  ;;  %v2768_v7 = vld [vmem:[#allocation2 + $0x120] sm:$0xff]  ;;  %v2364_v46 = vpop.f32.mrf.mxu3 }
0x14e3   :  { %1830 = vrot.lane.b32.xlu2 %v2722_v21, %s2863_s4  ;;  %2375 = vrot.lane.b32.xlu0 %v2344_v57, %s2863_s4  ;;  %v2365_v23 = vadd.f32 %v4035_v28, %v2364_v46 }
0x14e4   :  { %2160 = vrot.lane.b32.xlu1 %v3958_v44, %s2863_s4 }
0x14e5   :  { %v2728_v17 = vpop.eup %2727 }
0x14eb   :  { %2006 = vrot.lane.b32.xlu2 %v2724_v40, %s2862_s13  ;;  %2381 = vrot.lane.b32.xlu0 %v2353_v45, %s2863_s4  ;;  %v4075_v38 = vpop.permute.xlu1 %2098 }
0x14ec   :  { %2166 = vrot.lane.b32.xlu1 %v3971_v58, %s2863_s4 }
0x14f3   :  { %2128 = vrot.lane.b32.xlu2 %v3958_v44, %s2861_s12  ;;  %v4081_v4 = vpop.permute.xlu1 %2104 }
0x14f4   :  { %2172 = vrot.lane.b32.xlu1 %v3983_v10, %s2863_s4 }
0x14fb   :  { %2134 = vrot.lane.b32.xlu2 %v3971_v58, %s2861_s12 }
0x14fc   :  { %2377 = vrot.lane.b32.xlu1 %v2347_v60, %s2863_s4 }
0x1503   :  { %2140 = vrot.lane.b32.xlu2 %v3983_v10, %s2861_s12 }
0x1504   :  { %2383 = vrot.lane.b32.xlu1 %v2356_v9, %s2863_s4 }
0x150b   :  { %2162 = vrot.lane.b32.xlu2 %v3929_v1, %s2863_s4 }
0x150d   :  { %v4061_v41 = vpop.permute.xlu0 %2096 }
0x150e   :  { %v2120_v45 = vsub.f32 %v2767_v43, %v4061_v41 }
0x1510   :  { %v2200_v44 = vsel %vm186_vm6, %v2080_v5, %v2120_v45  ;;  %v2773_v45 = vld [vmem:[#allocation2 + $0x68] sm:$0xff] }
0x1513   :  { %2168 = vrot.lane.b32.xlu2 %v3941_v59, %s2863_s4 }
0x1515   :  { %v4065_v16 = vpop.permute.xlu0 %2102 }
0x151b   :  { %2379 = vrot.lane.b32.xlu2 %v2350_v11, %s2863_s4 }
0x151d   :  { %v4069_v42 = vpop.permute.xlu0 %2108 }
0x1525   :  { %v1919_v29 = vpop.permute.xlu0 %1918 }
0x152d   :  { %v2101_v53 = vpop.permute.xlu2 %2100  ;;  %v4073_v47 = vpop.permute.xlu0 %2130 }
0x152e   :  { %v2122_v33 = vsub.f32 %v3816_v51, %v2101_v53  ;;  %v2358_v53 = vpop.f32.mrf.mxu2 }
0x152f   :  { %v2359_v26 = vadd.f32 %v4035_v28, %v2358_v53 }
0x1530   :  { %v2202_v35 = vsel %vm186_vm6, %v2082_v63, %v2122_v33 }
0x1535   :  { %v2107_v49 = vpop.permute.xlu2 %2106  ;;  %v4079_v27 = vpop.permute.xlu0 %2136 }
0x1536   :  { %v2125_v39 = vsub.f32 %v3914_v24, %v2107_v49 }
0x1538   :  { %v2205_v8 = vsel %vm186_vm6, %v2085_v34, %v2125_v39 }
0x153d   :  { %v1831_v19 = vpop.permute.xlu2 %1830 }
0x153e   :  { %v1847_v36 = vadd.f32 %v2726_v52, %v1831_v19  ;;  %v2123_v19 = vsub.f32 %v3811_v32, %v4065_v16 }
0x1540   :  { %v1935_v2 = vadd.f32 %v1919_v29, %v1847_v36  ;;  %v2083_v36 = vsub.f32 %v3811_v32, %v3971_v58 }
0x1542   :  { %v2203_v16 = vsel %vm186_vm6, %v2083_v36, %v2123_v19  ;;  %v2777_v19 = vld [vmem:[#allocation2 + $0x108] sm:$0xff] }
0x1545   :  { %v2165_v54 = vpop.permute.xlu0 %2164  ;;  %v2007_v62 = vpop.permute.xlu2 %2006 }
0x1546   :  { %v2186_v50 = vsub.f32 %v3816_v51, %v2165_v54  ;;  %v2133_v25 = vpop.permute.xlu1 %2132  ;;  %v2023_v20 = vadd.f32 %v2007_v62, %v1935_v2  ;;  %v2769_v54 = vld [vmem:[#allocation2 + $0x90] sm:$0xff] }
0x1547   :  { %v2154_v22 = vsub.f32 %v3816_v51, %v2133_v25  ;;  %v2770_v25 = vld [vmem:[#allocation2 + $0x28] sm:$0xff] }
0x1548   :  { %v2055_v48 = vadd.f32 %v2728_v17, %v2023_v20  ;;  %v2121_v20 = vsub.f32 %v2770_v25, %v4075_v38  ;;  %v2771_v17 = vld [vmem:[#allocation2 + $0xf0] sm:$0xff] }
0x1549   :  { %v2211_v0 = vsel %vm2208_vm5, %v2202_v35, %v2154_v22  ;;  %v2126_v22 = vsub.f32 %v2771_v17, %v4069_v42  ;;  %v2153_v35 = vsub.f32 %v2770_v25, %v4073_v47 }
0x154a   :  { %v2220_v18 = vsel %vm2217_vm7, %v2211_v0, %v2186_v50  ;;  %2729 = vlog2.f32 %v2055_v48  ;;  %v2081_v48 = vsub.f32 %v2770_v25, %v3929_v1  ;;  %v2124_v1 = vsub.f32 %v3877_v61, %v4081_v4 }
0x154b   :  { %2423 = vst [vmem:[%s4224_s9 + $0x40] sm:$0xff] %v2220_v18 }
0x154c   :  { %v2201_v39 = vsel %vm186_vm6, %v2081_v48, %v2121_v20 }
0x154d   :  { %v2171_v15 = vpop.permute.xlu0 %2170  ;;  %v2129_v37 = vpop.permute.xlu2 %2128  ;;  %v2210_v34 = vsel %vm2208_vm5, %v2201_v39, %v2153_v35 }
0x154e   :  { %v2189_v51 = vsub.f32 %v3914_v24, %v2171_v15  ;;  %v2139_v12 = vpop.permute.xlu1 %2138 }
0x154f   :  { %v2157_v13 = vsub.f32 %v3914_v24, %v2139_v12  ;;  %v2152_v24 = vsub.f32 %v2767_v43, %v2129_v37 }
0x1550   :  { %v2730_v14 = vpop.eup %2729 }
0x1551   :  { %v2071_v55 = vmul.f32 0.6931472, %v2730_v14  ;;  %v2214_v57 = vsel %vm2208_vm5, %v2205_v8, %v2157_v13  ;;  %v2084_v13 = vsub.f32 %v3877_v61, %v3941_v59 }
0x1552   :  { %v2223_v21 = vsel %vm2217_vm7, %v2214_v57, %v2189_v51 }
0x1553   :  { %v4104_v40 = vadd.f32 %v2071_v55, %v3850_v31  ;;  %2435 = vst [vmem:[%s4224_s9 + $0xa0] sm:$0xff] %v2223_v21  ;;  %v2204_v8 = vsel %vm186_vm6, %v2084_v13, %v2124_v1  ;;  %v2772_v21 = vld [vmem:[#allocation2 + $0x40] sm:$0xff] }
0x1555   :  { %v2199_v60 = vsub.f32 %v2768_v7, %v4104_v40  ;;  %v2376_v6 = vpop.permute.xlu0 %2375  ;;  %2174 = vrot.lane.b32.xlu2 %v4104_v40, %s2863_s4  ;;  %2142 = vrot.lane.b32.xlu0 %v4104_v40, %s2861_s12  ;;  %v2135_v9 = vpop.permute.xlu2 %2134 }
0x1556   :  { %v2407_v31 = vsel %vm2217_vm7, %v3735_v30, %v2376_v6  ;;  %v2161_v41 = vpop.permute.xlu1 %2160  ;;  %2110 = vrot.lane.b32.xlu1 %v4104_v40, %s2862_s13  ;;  %v2209_v30 = vsel %vm2208_vm5, %v2200_v44, %v2152_v24  ;;  %v2155_v52 = vsub.f32 %v3811_v32, %v2135_v9  ;;  %v2774_v24 = vld [vmem:[#allocation2 + $0xb8] sm:$0xff]  ;;  %v2775_v6 = vld [vmem:[#allocation2 + $0xe0] sm:$0xff] }
0x1557   :  { %v2406_v11 = vsel %vm186_vm6, %v2199_v60, %v2768_v7  ;;  %2418 = vst [vmem:[%s4224_s9 + $0x18] sm:$0xff] %v2407_v31  ;;  %v2184_v29 = vsub.f32 %v2767_v43, %v2161_v41  ;;  %v2776_v41 = vld [vmem:[#allocation2 + $0x118] sm:$0xff] }
0x1558   :  { %2444 = vst [vmem:[%s4224_s9 + $0xe8] sm:$0xff] %v2406_v11  ;;  %v2212_v28 = vsel %vm2208_vm5, %v2203_v16, %v2155_v52 }
0x1559   :  { %v2218_v49 = vsel %vm2217_vm7, %v2209_v30, %v2184_v29  ;;  %v2087_v29 = vsub.f32 %v2776_v41, %v4104_v40  ;;  %v2778_v40 = vld [vmem:[#allocation2 + $0x130] sm:$0xff] }
0x155a   :  { %2415 = vst [vmem:[%s4224_s9] sm:$0xff] %v2218_v49 }
0x155d   :  { %v2382_v33 = vpop.permute.xlu0 %2381  ;;  %2385 = vrot.lane.b32.xlu2 %v2359_v26, %s2863_s4  ;;  %2387 = vrot.lane.b32.xlu0 %v2362_v56, %s2863_s4  ;;  %v2141_v2 = vpop.permute.xlu2 %2140 }
0x155e   :  { %v2410_v62 = vsel %vm2217_vm7, %v2769_v54, %v2382_v33  ;;  %v2167_v63 = vpop.permute.xlu1 %2166  ;;  %2389 = vrot.lane.b32.xlu1 %v2365_v23, %s2863_s4  ;;  %v2158_v0 = vsub.f32 %v2771_v17, %v2141_v2 }
0x155f   :  { %2430 = vst [vmem:[%s4224_s9 + $0x78] sm:$0xff] %v2410_v62  ;;  %v2187_v58 = vsub.f32 %v3811_v32, %v2167_v63  ;;  %v2086_v32 = vsub.f32 %v2771_v17, %v3983_v10  ;;  %v2156_v10 = vsub.f32 %v3877_v61, %v4079_v27 }
0x1561   :  { %v2221_v50 = vsel %vm2217_vm7, %v2212_v28, %v2187_v58  ;;  %v2206_v38 = vsel %vm186_vm6, %v2086_v32, %v2126_v22  ;;  %v2213_v57 = vsel %vm2208_vm5, %v2204_v8, %v2156_v10 }
0x1562   :  { %2427 = vst [vmem:[%s4224_s9 + $0x60] sm:$0xff] %v2221_v50  ;;  %v2215_v12 = vsel %vm2208_vm5, %v2206_v38, %v2158_v0 }
0x1565   :  { %v2163_v18 = vpop.permute.xlu2 %2162 }
0x1566   :  { %v2173_v15 = vpop.permute.xlu1 %2172  ;;  %v2185_v37 = vsub.f32 %v2770_v25, %v2163_v18 }
0x1567   :  { %v2190_v51 = vsub.f32 %v2771_v17, %v2173_v15 }
0x1568   :  { %v2219_v42 = vsel %vm2217_vm7, %v2210_v34, %v2185_v37 }
0x1569   :  { %v2224_v47 = vsel %vm2217_vm7, %v2215_v12, %v2190_v51  ;;  %2419 = vst [vmem:[%s4224_s9 + $0x20] sm:$0xff] %v2219_v42 }
0x156a   :  { %2439 = vst [vmem:[%s4224_s9 + $0xc0] sm:$0xff] %v2224_v47 }
0x156d   :  { %v2169_v14 = vpop.permute.xlu2 %2168 }
0x156e   :  { %v2378_v3 = vpop.permute.xlu1 %2377  ;;  %v2188_v55 = vsub.f32 %v3877_v61, %v2169_v14 }
0x156f   :  { %v2408_v4 = vsel %vm2217_vm7, %v2772_v21, %v2378_v3 }
0x1570   :  { %2422 = vst [vmem:[%s4224_s9 + $0x38] sm:$0xff] %v2408_v4  ;;  %v2222_v27 = vsel %vm2217_vm7, %v2213_v57, %v2188_v55 }
0x1571   :  { %2431 = vst [vmem:[%s4224_s9 + $0x80] sm:$0xff] %v2222_v27 }
0x1575   :  { %v2380_v59 = vpop.permute.xlu2 %2379 }
0x1576   :  { %v2384_v43 = vpop.permute.xlu1 %2383  ;;  %v2409_v61 = vsel %vm2217_vm7, %v2773_v45, %v2380_v59 }
0x1577   :  { %v2411_v5 = vsel %vm2217_vm7, %v2774_v24, %v2384_v43  ;;  %2426 = vst [vmem:[%s4224_s9 + $0x58] sm:$0xff] %v2409_v61 }
0x1578   :  { %2434 = vst [vmem:[%s4224_s9 + $0x98] sm:$0xff] %v2411_v5 }
0x15af   :  { %v2175_v7 = vpop.permute.xlu2 %2174 }
0x15b0   :  { %v2191_v30 = vsub.f32 %v2776_v41, %v2175_v7 }
0x15b7   :  { %v2386_v60 = vpop.permute.xlu2 %2385 }
0x15b8   :  { %v2412_v9 = vsel %vm2217_vm7, %v2775_v6, %v2386_v60 }
0x15b9   :  { %2438 = vst [vmem:[%s4224_s9 + $0xb8] sm:$0xff] %v2412_v9 }
0x15c7   :  { %v2143_v31 = vpop.permute.xlu0 %2142 }
0x15c8   :  { %v2159_v44 = vsub.f32 %v2776_v41, %v2143_v31  ;;  %v2111_v11 = vpop.permute.xlu1 %2110 }
0x15c9   :  { %v2127_v53 = vsub.f32 %v2776_v41, %v2111_v11 }
0x15cb   :  { %v2207_v46 = vsel %vm186_vm6, %v2087_v29, %v2127_v53 }
0x15cc   :  { %v2216_v49 = vsel %vm2208_vm5, %v2207_v46, %v2159_v44 }
0x15cd   :  { %v2225_v56 = vsel %vm2217_vm7, %v2216_v49, %v2191_v30 }
0x15ce   :  { %2443 = vst [vmem:[%s4224_s9 + $0xe0] sm:$0xff] %v2225_v56 }
0x15cf   :  { %v2388_v26 = vpop.permute.xlu0 %2387 }
0x15d0   :  { %v2413_v23 = vsel %vm2217_vm7, %v2777_v19, %v2388_v26  ;;  %v2390_v52 = vpop.permute.xlu1 %2389 }
0x15d1   :  { %2442 = vst [vmem:[%s4224_s9 + $0xd8] sm:$0xff] %v2413_v23  ;;  %v2414_v36 = vsel %vm2217_vm7, %v2778_v40, %v2390_v52 }
0x15d2   :  { %2446 = vst [vmem:[%s4224_s9 + $0xf8] sm:$0xff] %v2414_v36 }
0x15d3   :  { %2455 = vsyncpa [#allocation4], 1 }
0x15d4   :  { %2456 = vsyncpa [#allocation6], 1 }

</bundles_post_ra>
